<compile_context>
chip_gen: v6e
topology: v6e:2x2x1
jax: 0.10.0
libtpu: 0.0.40
codegen_flags: <defaults>
</compile_context>

<pallas_src>
import functools

import jax
import jax.numpy as jnp
import numpy as np
from jax.experimental import pallas as pl
from jax.experimental.pallas import tpu as pltpu


def _round_up(x, m):
    return (x + m - 1) // m * m


def _vmem_budget_bytes():
    """~75% of physical VMEM (128 MiB on v5e/v6e, 64 MiB on v7x)."""
    try:
        phys = int(pltpu.get_tpu_info().vmem_capacity_bytes)
    except Exception:
        phys = 64 * 1024 * 1024
    return int(phys * 0.75)


def _derive_time_chunk(T, BB, I_in, H_pad, budget_bytes):
    """Largest Tc whose double-buffered x/out blocks + gi scratch + resident
    weights fit the budget (amortizes the ~0.35us per-grid-step overhead)."""
    fixed = 2 * (I_in + H_pad) * 3 * H_pad * 4        # resident W_ih + W_hh (x2 bufs)
    fixed += 3 * BB * H_pad * 4 + (2 << 20)           # h_scratch, h_last, slack
    per_t = 4 * BB * (2 * I_in + 2 * H_pad + 3 * H_pad)
    tc = (budget_bytes - fixed) // per_t
    return int(max(1, min(tc, T, 128)))


def _unroll_factor(BB, H_pad):
    """Cap the inner-loop unroll so live vregs stay well under the 64-entry file."""
    blocks = max(1, (BB // 8) * (H_pad // 128))   # vregs per (BB, H_pad) tile
    live_per_step = 10 * blocks                   # gi(3) + gh(3) + r/z/n/h
    if 2 * live_per_step <= 48:
        return True
    return max(1, min(8, 48 // live_per_step))


# --------------------------------------------------------------------------
# Recurrent Pallas kernel.  Grid = (batch blocks [parallel], time chunks
# [arbitrary, sequential]).  Input projection is fused (done per chunk).
# --------------------------------------------------------------------------
def _gru_rec_kernel(x_ref, wih_ref, whh_ref, bcomb_ref, bhn_ref,
                    out_ref, hlast_ref, h_scratch, gi_scratch,
                    *, bb, hp, tc, t_valid, t_pad, unroll):
    """One (batch-block, time-chunk) grid step of the GRU recurrence.

    x_ref     : (Tc*BB, I_in)     streamed input rows (time-major within block)
    wih_ref   : (I_in, 3*H_pad)   input->gates weight, VMEM resident
    whh_ref   : (H_pad, 3*H_pad)  hidden->gates weight, VMEM resident
    bcomb_ref : (1, 3*H_pad)      b_ih+b_hh for r/z gates, b_ih for n gate
    bhn_ref   : (1, H_pad)        b_hh of the n gate (it is multiplied by r)
    out_ref   : (Tc*BB, H_pad)    per-timestep hidden states
    hlast_ref : (BB, H_pad)       final hidden state (written on last chunk)
    h_scratch : (BB, H_pad)       recurrent state carried across chunks
    gi_scratch: (Tc*BB, 3*H_pad)  chunk-level fused input projection
    """
    c = pl.program_id(1)

    @pl.when(c == 0)
    def _():
        h_scratch[...] = jnp.zeros_like(h_scratch)

    # Fused input projection for the whole chunk: one (Tc*BB, I) x (I, 3*H_pad)
    # MXU matmul (better row utilization than per-step 8-row matmuls); folded
    # r/z/n input biases are added here, once per chunk.
    gi_scratch[...] = (
        jnp.dot(x_ref[...], wih_ref[...], preferred_element_type=jnp.float32)
        + bcomb_ref[...])

    # Hoist the (1, H_pad) -> (BB, H_pad) broadcast out of the unrolled loop
    # (JAX does not CSE broadcast_in_dim).
    bhn_b = jnp.broadcast_to(bhn_ref[...], (bb, hp))

    def step(i, h):
        row = pl.multiple_of(i * bb, 8)
        gi = gi_scratch[pl.ds(row, bb), :]
        # TODO(synk): for genuinely tiny batch, pltpu.matmul_push_rhs could
        # stage the constant W_hh in the MXU once per chunk.
        gh = jnp.dot(h, whh_ref[...], preferred_element_type=jnp.float32)
        # PyTorch gate order [r, z, n]; slices fall on 128-lane boundaries.
        r = jax.nn.sigmoid(gi[:, 0:hp] + gh[:, 0:hp])
        z = jax.nn.sigmoid(gi[:, hp:2 * hp] + gh[:, hp:2 * hp])
        n = jnp.tanh(gi[:, 2 * hp:3 * hp] + r * (gh[:, 2 * hp:3 * hp] + bhn_b))
        h_new = n + z * (h - n)          # == (1-z)*n + z*h, one fewer VALU op
        if t_pad > t_valid:              # carry h through padded timesteps
            h_new = jnp.where(c * tc + i < t_valid, h_new, h)
        out_ref[pl.ds(row, bb), :] = h_new
        return h_new

    h = jax.lax.fori_loop(0, tc, step, h_scratch[...], unroll=unroll)
    h_scratch[...] = h

    @pl.when(c == pl.num_programs(1) - 1)
    def _():
        hlast_ref[...] = h


# --------------------------------------------------------------------------
# One GRU layer over the block-major 2-D activation layout.
# --------------------------------------------------------------------------
def _gru_layer(x2d, w_ih, w_hh, b_ih, b_hh, *, H, H_pad, BB, b_blocks,
               Tc, T_pad, T, vmem_budget):
    """x2d: (b_blocks*T_pad*BB, I_in) f32, rows ordered
    [batch-block][time][within-block batch]; I_in is a multiple of 128.

    Returns (out2d (b_blocks*T_pad*BB, H_pad), h_last (b_blocks*BB, H_pad))."""
    rows, I_in = x2d.shape
    n_chunks = T_pad // Tc

    w_ih = w_ih.astype(jnp.float32)
    w_hh = w_hh.astype(jnp.float32)
    b_ih = b_ih.astype(jnp.float32)
    b_hh = b_hh.astype(jnp.float32)

    def gates(m):
        return m[0:H], m[H:2 * H], m[2 * H:3 * H]

    wih_r, wih_z, wih_n = gates(w_ih)          # each (H, I_real)
    whh_r, whh_z, whh_n = gates(w_hh)          # each (H, H)
    bih_r, bih_z, bih_n = gates(b_ih)
    bhh_r, bhh_z, bhh_n = gates(b_hh)

    def prep_ih(m):                            # (H, I_real) -> (I_in, H_pad)
        mt = m.T
        return jnp.pad(mt, ((0, I_in - mt.shape[0]), (0, H_pad - H)))

    def prep_hh(m):                            # (H, H) -> (H_pad, H_pad)
        return jnp.pad(m.T, ((0, H_pad - H), (0, H_pad - H)))

    def pad_vec(v):
        return jnp.pad(v, (0, H_pad - H))

    # Lane-aligned [r | z | n] gate blocks; zero padding keeps padded hidden
    # lanes exactly 0 end-to-end.
    # TODO(synk): optional bf16 weights (f32 accumulate) would halve the
    # resident W_hh/W_ih VMEM and DMA on v6e/v7x (accuracy tradeoff).
    wih_t = jnp.concatenate([prep_ih(wih_r), prep_ih(wih_z), prep_ih(wih_n)], axis=1)
    whh_t = jnp.concatenate([prep_hh(whh_r), prep_hh(whh_z), prep_hh(whh_n)], axis=1)
    # b_ih + b_hh folded for r/z; only b_ih for n (its b_hh is scaled by r).
    bcomb = jnp.concatenate(
        [pad_vec(bih_r + bhh_r), pad_vec(bih_z + bhh_z), pad_vec(bih_n)])[None, :]
    bhn = pad_vec(bhh_n)[None, :]              # (1, H_pad)

    kernel = functools.partial(
        _gru_rec_kernel, bb=BB, hp=H_pad, tc=Tc, t_valid=T, t_pad=T_pad,
        unroll=_unroll_factor(BB, H_pad))

    # Explicit scoped-VMEM limit: double-buffered x/out blocks + resident
    # weights + scratches, with headroom; clipped to the physical budget.
    blk = 4 * Tc * BB * (I_in + H_pad)
    wgt = 4 * (I_in + H_pad) * 3 * H_pad
    scr = 4 * (BB * H_pad + Tc * BB * 3 * H_pad)
    misc = 4 * (4 * H_pad + 2 * BB * H_pad)
    vmem_limit = int(min(max((2 * blk + 2 * wgt + scr + misc) * 3 // 2,
                             32 * 1024 * 1024), vmem_budget))

    out2d, h_last = pl.pallas_call(
        kernel,
        out_shape=(
            jax.ShapeDtypeStruct((rows, H_pad), jnp.float32),
            jax.ShapeDtypeStruct((b_blocks * BB, H_pad), jnp.float32),
        ),
        grid_spec=pltpu.PrefetchScalarGridSpec(
            num_scalar_prefetch=0,
            grid=(b_blocks, n_chunks),
            in_specs=[
                pl.BlockSpec((Tc * BB, I_in),
                             lambda b, c: (b * n_chunks + c, 0)),
                # Constant index maps: weights/biases stay VMEM-resident.
                # TODO(synk): for H_pad >= ~1024 on v7x, store in bf16 and/or
                # single-buffer these specs (pipeline_mode=pl.Buffered(1)).
                pl.BlockSpec((I_in, 3 * H_pad), lambda b, c: (0, 0)),
                pl.BlockSpec((H_pad, 3 * H_pad), lambda b, c: (0, 0)),
                pl.BlockSpec((1, 3 * H_pad), lambda b, c: (0, 0)),
                pl.BlockSpec((1, H_pad), lambda b, c: (0, 0)),
            ],
            out_specs=(
                pl.BlockSpec((Tc * BB, H_pad),
                             lambda b, c: (b * n_chunks + c, 0)),
                pl.BlockSpec((BB, H_pad), lambda b, c: (b, 0)),
            ),
            scratch_shapes=[
                pltpu.VMEM((BB, H_pad), jnp.float32),
                pltpu.VMEM((Tc * BB, 3 * H_pad), jnp.float32),
            ],
        ),
        compiler_params=pltpu.CompilerParams(
            # Batch blocks are independent (parallel -> shards across v7x's
            # two TensorCores); the time recurrence is sequential (arbitrary).
            dimension_semantics=("parallel", "arbitrary"),
            vmem_limit_bytes=vmem_limit,
        ),
    )(x2d, wih_t, whh_t, bcomb, bhn)

    return out2d, h_last


# --------------------------------------------------------------------------
# Full module forward (batch_first API, like the PyTorch module).
# --------------------------------------------------------------------------
def vanilla_gru_forward(seq, params):
    """seq: (batch, time, input_size). Returns (output (B,T,H), hidden (L,B,H))."""
    B, T, I = seq.shape
    H = params[0][1].shape[1]
    H_pad = _round_up(H, 128)
    I_pad = _round_up(I, 128)
    B_pad = _round_up(B, 8)

    # Batch-block grid axis: 2 blocks when it divides cleanly and is big
    # enough to matter (v7x has 2 TensorCores; harmless no-op on v5e/v6e).
    b_blocks = 2 if (B_pad >= 16 and B_pad % 16 == 0) else 1
    BB = B_pad // b_blocks

    budget = _vmem_budget_bytes()
    Tc = _derive_time_chunk(T, BB, max(I_pad, H_pad), H_pad, budget * 3 // 5)
    T_pad = _round_up(T, Tc)

    # (B, T, I) -> time-major, pad batch/time/features, then block-major 2-D:
    # rows ordered [batch-block][time][within-block batch].  Every layer
    # consumes and produces this layout, so there is no per-layer relayout.
    x = jnp.transpose(seq.astype(jnp.float32), (1, 0, 2))         # (T, B, I)
    x = jnp.pad(x, ((0, T_pad - T), (0, B_pad - B), (0, I_pad - I)))
    x2d = (x.reshape(T_pad, b_blocks, BB, I_pad)
            .transpose(1, 0, 2, 3)
            .reshape(b_blocks * T_pad * BB, I_pad))

    # TODO(synk): all layers could be fused into a single pallas_call (keeping
    # every layer's weights resident) to remove the remaining per-layer HBM
    # round trip of the activations and the per-layer launch overhead.
    h_finals = []
    for (w_ih, w_hh, b_ih, b_hh) in params:
        x2d, h_last = _gru_layer(
            x2d, w_ih, w_hh, b_ih, b_hh, H=H, H_pad=H_pad, BB=BB,
            b_blocks=b_blocks, Tc=Tc, T_pad=T_pad, T=T, vmem_budget=budget)
        h_finals.append(h_last[:B, :H])

    out = (x2d.reshape(b_blocks, T_pad, BB, H_pad)
              .transpose(1, 0, 2, 3)
              .reshape(T_pad, B_pad, H_pad))
    output = jnp.transpose(out[:T, :B, :H], (1, 0, 2))            # (B, T, H)
    hidden = jnp.stack(h_finals, axis=0)                          # (L, B, H)
    return output, hidden


def init_gru_params(key, input_size, hidden_size, num_layers):
    """Deterministic init matching PyTorch nn.GRU parameter shapes:
    uniform(-1/sqrt(H), 1/sqrt(H))."""
    k = 1.0 / jnp.sqrt(jnp.float32(hidden_size))
    params = []
    for layer in range(num_layers):
        in_sz = input_size if layer == 0 else hidden_size
        key, k1, k2, k3, k4 = jax.random.split(key, 5)
        w_ih = jax.random.uniform(k1, (3 * hidden_size, in_sz), jnp.float32, -k, k)
        w_hh = jax.random.uniform(k2, (3 * hidden_size, hidden_size), jnp.float32, -k, k)
        b_ih = jax.random.uniform(k3, (3 * hidden_size,), jnp.float32, -k, k)
        b_hh = jax.random.uniform(k4, (3 * hidden_size,), jnp.float32, -k, k)
        params.append((w_ih, w_hh, b_ih, b_hh))
    return params


def _gru_reference(seq, params):
    """Pure-JAX reference matching PyTorch nn.GRU (for correctness check)."""
    x = jnp.transpose(seq, (1, 0, 2)).astype(jnp.float32)   # (T, B, I)
    h_finals = []
    for (w_ih, w_hh, b_ih, b_hh) in params:
        H = w_hh.shape[1]

        def step(h, x_t, w_ih=w_ih, w_hh=w_hh, b_ih=b_ih, b_hh=b_hh, H=H):
            gi = x_t @ w_ih.T + b_ih
            gh = h @ w_hh.T + b_hh
            r = jax.nn.sigmoid(gi[:, 0:H] + gh[:, 0:H])
            z = jax.nn.sigmoid(gi[:, H:2 * H] + gh[:, H:2 * H])
            n = jnp.tanh(gi[:, 2 * H:] + r * gh[:, 2 * H:])
            h_new = (1.0 - z) * n + z * h
            return h_new, h_new

        h0 = jnp.zeros((x.shape[1], H), jnp.float32)
        h_last, ys = jax.lax.scan(step, h0, x)
        x = ys
        h_finals.append(h_last)
    return jnp.transpose(x, (1, 0, 2)), jnp.stack(h_finals, axis=0)


if __name__ == "__main__":
    # Module hyper-params (output_size / dropout_rate unused in forward).
    input_size = 4
    hidden_size = 32
    num_layers = 2
    batch_size = 2
    seq_len = 8

    key = jax.random.PRNGKey(0)
    key, pkey, xkey = jax.random.split(key, 3)

    params = init_gru_params(pkey, input_size, hidden_size, num_layers)
    seq = jax.random.normal(xkey, (batch_size, seq_len, input_size), jnp.float32)

    fwd = jax.jit(vanilla_gru_forward)
    output, hidden = fwd(seq, params)
    output = jax.block_until_ready(output)
    hidden = jax.block_until_ready(hidden)

    assert output.shape == (batch_size, seq_len, hidden_size)
    assert hidden.shape == (num_layers, batch_size, hidden_size)

    ref_out, ref_hid = jax.jit(_gru_reference)(seq, params)
    np.testing.assert_allclose(np.asarray(output), np.asarray(ref_out),
                               rtol=5e-3, atol=5e-3)
    np.testing.assert_allclose(np.asarray(hidden), np.asarray(ref_hid),
                               rtol=5e-3, atol=5e-3)

    print("KERNEL_OK")
</pallas_src>

<mosaic_0001>
module attributes {stable_mosaic.version = 11 : i64} {
  func.func @_gru_rec_kernel(%arg0: i32, %arg1: i32, %arg2: memref<64x128xf32, #tpu.memory_space<vmem>>, %arg3: memref<128x384xf32, #tpu.memory_space<vmem>>, %arg4: memref<128x384xf32, #tpu.memory_space<vmem>>, %arg5: memref<1x384xf32, #tpu.memory_space<vmem>>, %arg6: memref<1x128xf32, #tpu.memory_space<vmem>>, %arg7: memref<64x128xf32, #tpu.memory_space<vmem>>, %arg8: memref<8x128xf32, #tpu.memory_space<vmem>>, %arg9: memref<8x128xf32, #tpu.memory_space<vmem>>, %arg10: memref<64x384xf32, #tpu.memory_space<vmem>>) attributes {dimension_semantics = [#tpu.dimension_semantics<parallel>, #tpu.dimension_semantics<arbitrary>], iteration_bounds = array<i64: 1, 1>, scalar_prefetch = 0 : i64, scratch_operands = 2 : i64, tpu.core_type = #tpu.core_type<tc>, window_params = [{transform_indices = @transform_0, window_bounds = array<i64: 64, 128>}, {pipeline_mode = #tpu.pipeline_mode<synchronous>, transform_indices = @transform_1, window_bounds = array<i64: 128, 384>}, {pipeline_mode = #tpu.pipeline_mode<synchronous>, transform_indices = @transform_2, window_bounds = array<i64: 128, 384>}, {pipeline_mode = #tpu.pipeline_mode<synchronous>, transform_indices = @transform_3, window_bounds = array<i64: 1, 384>}, {pipeline_mode = #tpu.pipeline_mode<synchronous>, transform_indices = @transform_4, window_bounds = array<i64: 1, 128>}, {transform_indices = @transform_5, window_bounds = array<i64: 64, 128>}, {transform_indices = @transform_6, window_bounds = array<i64: 8, 128>}]} {
    %c0_i32 = arith.constant 0 : i32
    %0 = arith.cmpi eq, %arg1, %c0_i32 : i32
    %1 = arith.extui %0 : i1 to i32
    %c0_i32_0 = arith.constant 0 : i32
    %2 = arith.cmpi ne, %1, %c0_i32_0 : i32
    scf.if %2 {
      %cst_81 = arith.constant 0.000000e+00 : f32
      %282 = vector.broadcast %cst_81 : f32 to vector<8x128xf32>
      %c0_82 = arith.constant 0 : index
      %c0_83 = arith.constant 0 : index
      %283 = vector.load %arg9[%c0_82, %c0_83] : memref<8x128xf32, #tpu.memory_space<vmem>>, vector<8x128xf32>
      tpu.vector_store %arg9[%c0_82, %c0_83], %282 {strides = array<i32>} : memref<8x128xf32, #tpu.memory_space<vmem>>, vector<8x128xf32>,
    } else {
    }
    %c0 = arith.constant 0 : index
    %c0_1 = arith.constant 0 : index
    %3 = vector.load %arg2[%c0, %c0_1] : memref<64x128xf32, #tpu.memory_space<vmem>>, vector<64x128xf32>
    %c0_2 = arith.constant 0 : index
    %c0_3 = arith.constant 0 : index
    %4 = vector.load %arg3[%c0_2, %c0_3] : memref<128x384xf32, #tpu.memory_space<vmem>>, vector<128x384xf32>
    %cst = arith.constant dense<0.000000e+00> : vector<64x384xf32>
    %5 = tpu.matmul %3, %4, %cst {dimension_numbers = #tpu.dot_dimension_numbers<[1], [0], [0], [1], [0, 0, 1, 1], [], []>} : vector<64x128xf32>, vector<128x384xf32>, vector<64x384xf32> -> vector<64x384xf32>
    %c0_4 = arith.constant 0 : index
    %c0_5 = arith.constant 0 : index
    %6 = vector.load %arg5[%c0_4, %c0_5] : memref<1x384xf32, #tpu.memory_space<vmem>>, vector<1x384xf32>
    %7 = vector.broadcast %6 : vector<1x384xf32> to vector<64x384xf32>
    %8 = arith.addf %5, %7 : vector<64x384xf32>
    %c0_6 = arith.constant 0 : index
    %c0_7 = arith.constant 0 : index
    %9 = vector.load %arg10[%c0_6, %c0_7] : memref<64x384xf32, #tpu.memory_space<vmem>>, vector<64x384xf32>
    tpu.vector_store %arg10[%c0_6, %c0_7], %8 {strides = array<i32>} : memref<64x384xf32, #tpu.memory_space<vmem>>, vector<64x384xf32>,
    %c0_8 = arith.constant 0 : index
    %c0_9 = arith.constant 0 : index
    %10 = vector.load %arg6[%c0_8, %c0_9] : memref<1x128xf32, #tpu.memory_space<vmem>>, vector<1x128xf32>
    %11 = vector.shape_cast %10 : vector<1x128xf32> to vector<1x128xf32>
    %12 = vector.broadcast %11 : vector<1x128xf32> to vector<8x128xf32>
    %c0_10 = arith.constant 0 : index
    %c0_11 = arith.constant 0 : index
    %13 = vector.load %arg9[%c0_10, %c0_11] : memref<8x128xf32, #tpu.memory_space<vmem>>, vector<8x128xf32>
    %c0_i32_12 = arith.constant 0 : i32
    %c8_i32 = arith.constant 8 : i32
    %14 = arith.muli %c0_i32_12, %c8_i32 : i32
    %15 = tpu.assume_multiple %14, 8 : i32
    %16 = arith.index_cast %15 : i32 to index
    %c0_13 = arith.constant 0 : index
    %17 = vector.load %arg10[%16, %c0_13] : memref<64x384xf32, #tpu.memory_space<vmem>>, vector<8x384xf32>
    %c0_14 = arith.constant 0 : index
    %c0_15 = arith.constant 0 : index
    %18 = vector.load %arg4[%c0_14, %c0_15] : memref<128x384xf32, #tpu.memory_space<vmem>>, vector<128x384xf32>
    %cst_16 = arith.constant dense<0.000000e+00> : vector<8x384xf32>
    %19 = tpu.matmul %13, %18, %cst_16 {dimension_numbers = #tpu.dot_dimension_numbers<[1], [0], [0], [1], [0, 0, 1, 1], [], []>} : vector<8x128xf32>, vector<128x384xf32>, vector<8x384xf32> -> vector<8x384xf32>
    %20 = vector.extract_strided_slice %17 {offsets = [0, 0], sizes = [8, 128], strides = [1, 1]} : vector<8x384xf32> to vector<8x128xf32>
    %21 = vector.extract_strided_slice %19 {offsets = [0, 0], sizes = [8, 128], strides = [1, 1]} : vector<8x384xf32> to vector<8x128xf32>
    %22 = arith.addf %20, %21 : vector<8x128xf32>
    %23 = arith.negf %22 : vector<8x128xf32>
    %24 = math.exp %23 : vector<8x128xf32>
    %cst_17 = arith.constant 1.000000e+00 : f32
    %25 = vector.broadcast %cst_17 : f32 to vector<8x128xf32>
    %26 = arith.addf %25, %24 : vector<8x128xf32>
    %27 = arith.divf %25, %26 : vector<8x128xf32>
    %28 = vector.extract_strided_slice %17 {offsets = [0, 128], sizes = [8, 128], strides = [1, 1]} : vector<8x384xf32> to vector<8x128xf32>
    %29 = vector.extract_strided_slice %19 {offsets = [0, 128], sizes = [8, 128], strides = [1, 1]} : vector<8x384xf32> to vector<8x128xf32>
    %30 = arith.addf %28, %29 : vector<8x128xf32>
    %31 = arith.negf %30 : vector<8x128xf32>
    %32 = math.exp %31 : vector<8x128xf32>
    %cst_18 = arith.constant 1.000000e+00 : f32
    %33 = vector.broadcast %cst_18 : f32 to vector<8x128xf32>
    %34 = arith.addf %33, %32 : vector<8x128xf32>
    %35 = arith.divf %33, %34 : vector<8x128xf32>
    %36 = vector.extract_strided_slice %17 {offsets = [0, 256], sizes = [8, 128], strides = [1, 1]} : vector<8x384xf32> to vector<8x128xf32>
    %37 = vector.extract_strided_slice %19 {offsets = [0, 256], sizes = [8, 128], strides = [1, 1]} : vector<8x384xf32> to vector<8x128xf32>
    %38 = arith.addf %37, %12 : vector<8x128xf32>
    %39 = arith.mulf %27, %38 : vector<8x128xf32>
    %40 = arith.addf %36, %39 : vector<8x128xf32>
    %41 = math.tanh %40 : vector<8x128xf32>
    %42 = arith.subf %13, %41 : vector<8x128xf32>
    %43 = arith.mulf %35, %42 : vector<8x128xf32>
    %44 = arith.addf %41, %43 : vector<8x128xf32>
    %45 = arith.index_cast %15 : i32 to index
    %c0_19 = arith.constant 0 : index
    %46 = vector.load %arg7[%45, %c0_19] : memref<64x128xf32, #tpu.memory_space<vmem>>, vector<8x128xf32>
    tpu.vector_store %arg7[%45, %c0_19], %44 {strides = array<i32>} : memref<64x128xf32, #tpu.memory_space<vmem>>, vector<8x128xf32>,
    %c1_i32 = arith.constant 1 : i32
    %c8_i32_20 = arith.constant 8 : i32
    %47 = arith.muli %c1_i32, %c8_i32_20 : i32
    %48 = tpu.assume_multiple %47, 8 : i32
    %49 = arith.index_cast %48 : i32 to index
    %c0_21 = arith.constant 0 : index
    %50 = vector.load %arg10[%49, %c0_21] : memref<64x384xf32, #tpu.memory_space<vmem>>, vector<8x384xf32>
    %c0_22 = arith.constant 0 : index
    %c0_23 = arith.constant 0 : index
    %51 = vector.load %arg4[%c0_22, %c0_23] : memref<128x384xf32, #tpu.memory_space<vmem>>, vector<128x384xf32>
    %cst_24 = arith.constant dense<0.000000e+00> : vector<8x384xf32>
    %52 = tpu.matmul %44, %51, %cst_24 {dimension_numbers = #tpu.dot_dimension_numbers<[1], [0], [0], [1], [0, 0, 1, 1], [], []>} : vector<8x128xf32>, vector<128x384xf32>, vector<8x384xf32> -> vector<8x384xf32>
    %53 = vector.extract_strided_slice %50 {offsets = [0, 0], sizes = [8, 128], strides = [1, 1]} : vector<8x384xf32> to vector<8x128xf32>
    %54 = vector.extract_strided_slice %52 {offsets = [0, 0], sizes = [8, 128], strides = [1, 1]} : vector<8x384xf32> to vector<8x128xf32>
    %55 = arith.addf %53, %54 : vector<8x128xf32>
    %56 = arith.negf %55 : vector<8x128xf32>
    %57 = math.exp %56 : vector<8x128xf32>
    %cst_25 = arith.constant 1.000000e+00 : f32
    %58 = vector.broadcast %cst_25 : f32 to vector<8x128xf32>
    %59 = arith.addf %58, %57 : vector<8x128xf32>
    %60 = arith.divf %58, %59 : vector<8x128xf32>
    %61 = vector.extract_strided_slice %50 {offsets = [0, 128], sizes = [8, 128], strides = [1, 1]} : vector<8x384xf32> to vector<8x128xf32>
    %62 = vector.extract_strided_slice %52 {offsets = [0, 128], sizes = [8, 128], strides = [1, 1]} : vector<8x384xf32> to vector<8x128xf32>
    %63 = arith.addf %61, %62 : vector<8x128xf32>
    %64 = arith.negf %63 : vector<8x128xf32>
    %65 = math.exp %64 : vector<8x128xf32>
    %cst_26 = arith.constant 1.000000e+00 : f32
    %66 = vector.broadcast %cst_26 : f32 to vector<8x128xf32>
    %67 = arith.addf %66, %65 : vector<8x128xf32>
    %68 = arith.divf %66, %67 : vector<8x128xf32>
    %69 = vector.extract_strided_slice %50 {offsets = [0, 256], sizes = [8, 128], strides = [1, 1]} : vector<8x384xf32> to vector<8x128xf32>
    %70 = vector.extract_strided_slice %52 {offsets = [0, 256], sizes = [8, 128], strides = [1, 1]} : vector<8x384xf32> to vector<8x128xf32>
    %71 = arith.addf %70, %12 : vector<8x128xf32>
    %72 = arith.mulf %60, %71 : vector<8x128xf32>
    %73 = arith.addf %69, %72 : vector<8x128xf32>
    %74 = math.tanh %73 : vector<8x128xf32>
    %75 = arith.subf %44, %74 : vector<8x128xf32>
    %76 = arith.mulf %68, %75 : vector<8x128xf32>
    %77 = arith.addf %74, %76 : vector<8x128xf32>
    %78 = arith.index_cast %48 : i32 to index
    %c0_27 = arith.constant 0 : index
    %79 = vector.load %arg7[%78, %c0_27] : memref<64x128xf32, #tpu.memory_space<vmem>>, vector<8x128xf32>
    tpu.vector_store %arg7[%78, %c0_27], %77 {strides = array<i32>} : memref<64x128xf32, #tpu.memory_space<vmem>>, vector<8x128xf32>,
    %c2_i32 = arith.constant 2 : i32
    %c8_i32_28 = arith.constant 8 : i32
    %80 = arith.muli %c2_i32, %c8_i32_28 : i32
    %81 = tpu.assume_multiple %80, 8 : i32
    %82 = arith.index_cast %81 : i32 to index
    %c0_29 = arith.constant 0 : index
    %83 = vector.load %arg10[%82, %c0_29] : memref<64x384xf32, #tpu.memory_space<vmem>>, vector<8x384xf32>
    %c0_30 = arith.constant 0 : index
    %c0_31 = arith.constant 0 : index
    %84 = vector.load %arg4[%c0_30, %c0_31] : memref<128x384xf32, #tpu.memory_space<vmem>>, vector<128x384xf32>
    %cst_32 = arith.constant dense<0.000000e+00> : vector<8x384xf32>
    %85 = tpu.matmul %77, %84, %cst_32 {dimension_numbers = #tpu.dot_dimension_numbers<[1], [0], [0], [1], [0, 0, 1, 1], [], []>} : vector<8x128xf32>, vector<128x384xf32>, vector<8x384xf32> -> vector<8x384xf32>
    %86 = vector.extract_strided_slice %83 {offsets = [0, 0], sizes = [8, 128], strides = [1, 1]} : vector<8x384xf32> to vector<8x128xf32>
    %87 = vector.extract_strided_slice %85 {offsets = [0, 0], sizes = [8, 128], strides = [1, 1]} : vector<8x384xf32> to vector<8x128xf32>
    %88 = arith.addf %86, %87 : vector<8x128xf32>
    %89 = arith.negf %88 : vector<8x128xf32>
    %90 = math.exp %89 : vector<8x128xf32>
    %cst_33 = arith.constant 1.000000e+00 : f32
    %91 = vector.broadcast %cst_33 : f32 to vector<8x128xf32>
    %92 = arith.addf %91, %90 : vector<8x128xf32>
    %93 = arith.divf %91, %92 : vector<8x128xf32>
    %94 = vector.extract_strided_slice %83 {offsets = [0, 128], sizes = [8, 128], strides = [1, 1]} : vector<8x384xf32> to vector<8x128xf32>
    %95 = vector.extract_strided_slice %85 {offsets = [0, 128], sizes = [8, 128], strides = [1, 1]} : vector<8x384xf32> to vector<8x128xf32>
    %96 = arith.addf %94, %95 : vector<8x128xf32>
    %97 = arith.negf %96 : vector<8x128xf32>
    %98 = math.exp %97 : vector<8x128xf32>
    %cst_34 = arith.constant 1.000000e+00 : f32
    %99 = vector.broadcast %cst_34 : f32 to vector<8x128xf32>
    %100 = arith.addf %99, %98 : vector<8x128xf32>
    %101 = arith.divf %99, %100 : vector<8x128xf32>
    %102 = vector.extract_strided_slice %83 {offsets = [0, 256], sizes = [8, 128], strides = [1, 1]} : vector<8x384xf32> to vector<8x128xf32>
    %103 = vector.extract_strided_slice %85 {offsets = [0, 256], sizes = [8, 128], strides = [1, 1]} : vector<8x384xf32> to vector<8x128xf32>
    %104 = arith.addf %103, %12 : vector<8x128xf32>
    %105 = arith.mulf %93, %104 : vector<8x128xf32>
    %106 = arith.addf %102, %105 : vector<8x128xf32>
    %107 = math.tanh %106 : vector<8x128xf32>
    %108 = arith.subf %77, %107 : vector<8x128xf32>
    %109 = arith.mulf %101, %108 : vector<8x128xf32>
    %110 = arith.addf %107, %109 : vector<8x128xf32>
    %111 = arith.index_cast %81 : i32 to index
    %c0_35 = arith.constant 0 : index
    %112 = vector.load %arg7[%111, %c0_35] : memref<64x128xf32, #tpu.memory_space<vmem>>, vector<8x128xf32>
    tpu.vector_store %arg7[%111, %c0_35], %110 {strides = array<i32>} : memref<64x128xf32, #tpu.memory_space<vmem>>, vector<8x128xf32>,
    %c3_i32 = arith.constant 3 : i32
    %c8_i32_36 = arith.constant 8 : i32
    %113 = arith.muli %c3_i32, %c8_i32_36 : i32
    %114 = tpu.assume_multiple %113, 8 : i32
    %115 = arith.index_cast %114 : i32 to index
    %c0_37 = arith.constant 0 : index
    %116 = vector.load %arg10[%115, %c0_37] : memref<64x384xf32, #tpu.memory_space<vmem>>, vector<8x384xf32>
    %c0_38 = arith.constant 0 : index
    %c0_39 = arith.constant 0 : index
    %117 = vector.load %arg4[%c0_38, %c0_39] : memref<128x384xf32, #tpu.memory_space<vmem>>, vector<128x384xf32>
    %cst_40 = arith.constant dense<0.000000e+00> : vector<8x384xf32>
    %118 = tpu.matmul %110, %117, %cst_40 {dimension_numbers = #tpu.dot_dimension_numbers<[1], [0], [0], [1], [0, 0, 1, 1], [], []>} : vector<8x128xf32>, vector<128x384xf32>, vector<8x384xf32> -> vector<8x384xf32>
    %119 = vector.extract_strided_slice %116 {offsets = [0, 0], sizes = [8, 128], strides = [1, 1]} : vector<8x384xf32> to vector<8x128xf32>
    %120 = vector.extract_strided_slice %118 {offsets = [0, 0], sizes = [8, 128], strides = [1, 1]} : vector<8x384xf32> to vector<8x128xf32>
    %121 = arith.addf %119, %120 : vector<8x128xf32>
    %122 = arith.negf %121 : vector<8x128xf32>
    %123 = math.exp %122 : vector<8x128xf32>
    %cst_41 = arith.constant 1.000000e+00 : f32
    %124 = vector.broadcast %cst_41 : f32 to vector<8x128xf32>
    %125 = arith.addf %124, %123 : vector<8x128xf32>
    %126 = arith.divf %124, %125 : vector<8x128xf32>
    %127 = vector.extract_strided_slice %116 {offsets = [0, 128], sizes = [8, 128], strides = [1, 1]} : vector<8x384xf32> to vector<8x128xf32>
    %128 = vector.extract_strided_slice %118 {offsets = [0, 128], sizes = [8, 128], strides = [1, 1]} : vector<8x384xf32> to vector<8x128xf32>
    %129 = arith.addf %127, %128 : vector<8x128xf32>
    %130 = arith.negf %129 : vector<8x128xf32>
    %131 = math.exp %130 : vector<8x128xf32>
    %cst_42 = arith.constant 1.000000e+00 : f32
    %132 = vector.broadcast %cst_42 : f32 to vector<8x128xf32>
    %133 = arith.addf %132, %131 : vector<8x128xf32>
    %134 = arith.divf %132, %133 : vector<8x128xf32>
    %135 = vector.extract_strided_slice %116 {offsets = [0, 256], sizes = [8, 128], strides = [1, 1]} : vector<8x384xf32> to vector<8x128xf32>
    %136 = vector.extract_strided_slice %118 {offsets = [0, 256], sizes = [8, 128], strides = [1, 1]} : vector<8x384xf32> to vector<8x128xf32>
    %137 = arith.addf %136, %12 : vector<8x128xf32>
    %138 = arith.mulf %126, %137 : vector<8x128xf32>
    %139 = arith.addf %135, %138 : vector<8x128xf32>
    %140 = math.tanh %139 : vector<8x128xf32>
    %141 = arith.subf %110, %140 : vector<8x128xf32>
    %142 = arith.mulf %134, %141 : vector<8x128xf32>
    %143 = arith.addf %140, %142 : vector<8x128xf32>
    %144 = arith.index_cast %114 : i32 to index
    %c0_43 = arith.constant 0 : index
    %145 = vector.load %arg7[%144, %c0_43] : memref<64x128xf32, #tpu.memory_space<vmem>>, vector<8x128xf32>
    tpu.vector_store %arg7[%144, %c0_43], %143 {strides = array<i32>} : memref<64x128xf32, #tpu.memory_space<vmem>>, vector<8x128xf32>,
    %c4_i32 = arith.constant 4 : i32
    %c8_i32_44 = arith.constant 8 : i32
    %146 = arith.muli %c4_i32, %c8_i32_44 : i32
    %147 = tpu.assume_multiple %146, 8 : i32
    %148 = arith.index_cast %147 : i32 to index
    %c0_45 = arith.constant 0 : index
    %149 = vector.load %arg10[%148, %c0_45] : memref<64x384xf32, #tpu.memory_space<vmem>>, vector<8x384xf32>
    %c0_46 = arith.constant 0 : index
    %c0_47 = arith.constant 0 : index
    %150 = vector.load %arg4[%c0_46, %c0_47] : memref<128x384xf32, #tpu.memory_space<vmem>>, vector<128x384xf32>
    %cst_48 = arith.constant dense<0.000000e+00> : vector<8x384xf32>
    %151 = tpu.matmul %143, %150, %cst_48 {dimension_numbers = #tpu.dot_dimension_numbers<[1], [0], [0], [1], [0, 0, 1, 1], [], []>} : vector<8x128xf32>, vector<128x384xf32>, vector<8x384xf32> -> vector<8x384xf32>
    %152 = vector.extract_strided_slice %149 {offsets = [0, 0], sizes = [8, 128], strides = [1, 1]} : vector<8x384xf32> to vector<8x128xf32>
    %153 = vector.extract_strided_slice %151 {offsets = [0, 0], sizes = [8, 128], strides = [1, 1]} : vector<8x384xf32> to vector<8x128xf32>
    %154 = arith.addf %152, %153 : vector<8x128xf32>
    %155 = arith.negf %154 : vector<8x128xf32>
    %156 = math.exp %155 : vector<8x128xf32>
    %cst_49 = arith.constant 1.000000e+00 : f32
    %157 = vector.broadcast %cst_49 : f32 to vector<8x128xf32>
    %158 = arith.addf %157, %156 : vector<8x128xf32>
    %159 = arith.divf %157, %158 : vector<8x128xf32>
    %160 = vector.extract_strided_slice %149 {offsets = [0, 128], sizes = [8, 128], strides = [1, 1]} : vector<8x384xf32> to vector<8x128xf32>
    %161 = vector.extract_strided_slice %151 {offsets = [0, 128], sizes = [8, 128], strides = [1, 1]} : vector<8x384xf32> to vector<8x128xf32>
    %162 = arith.addf %160, %161 : vector<8x128xf32>
    %163 = arith.negf %162 : vector<8x128xf32>
    %164 = math.exp %163 : vector<8x128xf32>
    %cst_50 = arith.constant 1.000000e+00 : f32
    %165 = vector.broadcast %cst_50 : f32 to vector<8x128xf32>
    %166 = arith.addf %165, %164 : vector<8x128xf32>
    %167 = arith.divf %165, %166 : vector<8x128xf32>
    %168 = vector.extract_strided_slice %149 {offsets = [0, 256], sizes = [8, 128], strides = [1, 1]} : vector<8x384xf32> to vector<8x128xf32>
    %169 = vector.extract_strided_slice %151 {offsets = [0, 256], sizes = [8, 128], strides = [1, 1]} : vector<8x384xf32> to vector<8x128xf32>
    %170 = arith.addf %169, %12 : vector<8x128xf32>
    %171 = arith.mulf %159, %170 : vector<8x128xf32>
    %172 = arith.addf %168, %171 : vector<8x128xf32>
    %173 = math.tanh %172 : vector<8x128xf32>
    %174 = arith.subf %143, %173 : vector<8x128xf32>
    %175 = arith.mulf %167, %174 : vector<8x128xf32>
    %176 = arith.addf %173, %175 : vector<8x128xf32>
    %177 = arith.index_cast %147 : i32 to index
    %c0_51 = arith.constant 0 : index
    %178 = vector.load %arg7[%177, %c0_51] : memref<64x128xf32, #tpu.memory_space<vmem>>, vector<8x128xf32>
    tpu.vector_store %arg7[%177, %c0_51], %176 {strides = array<i32>} : memref<64x128xf32, #tpu.memory_space<vmem>>, vector<8x128xf32>,
    %c5_i32 = arith.constant 5 : i32
    %c8_i32_52 = arith.constant 8 : i32
    %179 = arith.muli %c5_i32, %c8_i32_52 : i32
    %180 = tpu.assume_multiple %179, 8 : i32
    %181 = arith.index_cast %180 : i32 to index
    %c0_53 = arith.constant 0 : index
    %182 = vector.load %arg10[%181, %c0_53] : memref<64x384xf32, #tpu.memory_space<vmem>>, vector<8x384xf32>
    %c0_54 = arith.constant 0 : index
    %c0_55 = arith.constant 0 : index
    %183 = vector.load %arg4[%c0_54, %c0_55] : memref<128x384xf32, #tpu.memory_space<vmem>>, vector<128x384xf32>
    %cst_56 = arith.constant dense<0.000000e+00> : vector<8x384xf32>
    %184 = tpu.matmul %176, %183, %cst_56 {dimension_numbers = #tpu.dot_dimension_numbers<[1], [0], [0], [1], [0, 0, 1, 1], [], []>} : vector<8x128xf32>, vector<128x384xf32>, vector<8x384xf32> -> vector<8x384xf32>
    %185 = vector.extract_strided_slice %182 {offsets = [0, 0], sizes = [8, 128], strides = [1, 1]} : vector<8x384xf32> to vector<8x128xf32>
    %186 = vector.extract_strided_slice %184 {offsets = [0, 0], sizes = [8, 128], strides = [1, 1]} : vector<8x384xf32> to vector<8x128xf32>
    %187 = arith.addf %185, %186 : vector<8x128xf32>
    %188 = arith.negf %187 : vector<8x128xf32>
    %189 = math.exp %188 : vector<8x128xf32>
    %cst_57 = arith.constant 1.000000e+00 : f32
    %190 = vector.broadcast %cst_57 : f32 to vector<8x128xf32>
    %191 = arith.addf %190, %189 : vector<8x128xf32>
    %192 = arith.divf %190, %191 : vector<8x128xf32>
    %193 = vector.extract_strided_slice %182 {offsets = [0, 128], sizes = [8, 128], strides = [1, 1]} : vector<8x384xf32> to vector<8x128xf32>
    %194 = vector.extract_strided_slice %184 {offsets = [0, 128], sizes = [8, 128], strides = [1, 1]} : vector<8x384xf32> to vector<8x128xf32>
    %195 = arith.addf %193, %194 : vector<8x128xf32>
    %196 = arith.negf %195 : vector<8x128xf32>
    %197 = math.exp %196 : vector<8x128xf32>
    %cst_58 = arith.constant 1.000000e+00 : f32
    %198 = vector.broadcast %cst_58 : f32 to vector<8x128xf32>
    %199 = arith.addf %198, %197 : vector<8x128xf32>
    %200 = arith.divf %198, %199 : vector<8x128xf32>
    %201 = vector.extract_strided_slice %182 {offsets = [0, 256], sizes = [8, 128], strides = [1, 1]} : vector<8x384xf32> to vector<8x128xf32>
    %202 = vector.extract_strided_slice %184 {offsets = [0, 256], sizes = [8, 128], strides = [1, 1]} : vector<8x384xf32> to vector<8x128xf32>
    %203 = arith.addf %202, %12 : vector<8x128xf32>
    %204 = arith.mulf %192, %203 : vector<8x128xf32>
    %205 = arith.addf %201, %204 : vector<8x128xf32>
    %206 = math.tanh %205 : vector<8x128xf32>
    %207 = arith.subf %176, %206 : vector<8x128xf32>
    %208 = arith.mulf %200, %207 : vector<8x128xf32>
    %209 = arith.addf %206, %208 : vector<8x128xf32>
    %210 = arith.index_cast %180 : i32 to index
    %c0_59 = arith.constant 0 : index
    %211 = vector.load %arg7[%210, %c0_59] : memref<64x128xf32, #tpu.memory_space<vmem>>, vector<8x128xf32>
    tpu.vector_store %arg7[%210, %c0_59], %209 {strides = array<i32>} : memref<64x128xf32, #tpu.memory_space<vmem>>, vector<8x128xf32>,
    %c6_i32 = arith.constant 6 : i32
    %c8_i32_60 = arith.constant 8 : i32
    %212 = arith.muli %c6_i32, %c8_i32_60 : i32
    %213 = tpu.assume_multiple %212, 8 : i32
    %214 = arith.index_cast %213 : i32 to index
    %c0_61 = arith.constant 0 : index
    %215 = vector.load %arg10[%214, %c0_61] : memref<64x384xf32, #tpu.memory_space<vmem>>, vector<8x384xf32>
    %c0_62 = arith.constant 0 : index
    %c0_63 = arith.constant 0 : index
    %216 = vector.load %arg4[%c0_62, %c0_63] : memref<128x384xf32, #tpu.memory_space<vmem>>, vector<128x384xf32>
    %cst_64 = arith.constant dense<0.000000e+00> : vector<8x384xf32>
    %217 = tpu.matmul %209, %216, %cst_64 {dimension_numbers = #tpu.dot_dimension_numbers<[1], [0], [0], [1], [0, 0, 1, 1], [], []>} : vector<8x128xf32>, vector<128x384xf32>, vector<8x384xf32> -> vector<8x384xf32>
    %218 = vector.extract_strided_slice %215 {offsets = [0, 0], sizes = [8, 128], strides = [1, 1]} : vector<8x384xf32> to vector<8x128xf32>
    %219 = vector.extract_strided_slice %217 {offsets = [0, 0], sizes = [8, 128], strides = [1, 1]} : vector<8x384xf32> to vector<8x128xf32>
    %220 = arith.addf %218, %219 : vector<8x128xf32>
    %221 = arith.negf %220 : vector<8x128xf32>
    %222 = math.exp %221 : vector<8x128xf32>
    %cst_65 = arith.constant 1.000000e+00 : f32
    %223 = vector.broadcast %cst_65 : f32 to vector<8x128xf32>
    %224 = arith.addf %223, %222 : vector<8x128xf32>
    %225 = arith.divf %223, %224 : vector<8x128xf32>
    %226 = vector.extract_strided_slice %215 {offsets = [0, 128], sizes = [8, 128], strides = [1, 1]} : vector<8x384xf32> to vector<8x128xf32>
    %227 = vector.extract_strided_slice %217 {offsets = [0, 128], sizes = [8, 128], strides = [1, 1]} : vector<8x384xf32> to vector<8x128xf32>
    %228 = arith.addf %226, %227 : vector<8x128xf32>
    %229 = arith.negf %228 : vector<8x128xf32>
    %230 = math.exp %229 : vector<8x128xf32>
    %cst_66 = arith.constant 1.000000e+00 : f32
    %231 = vector.broadcast %cst_66 : f32 to vector<8x128xf32>
    %232 = arith.addf %231, %230 : vector<8x128xf32>
    %233 = arith.divf %231, %232 : vector<8x128xf32>
    %234 = vector.extract_strided_slice %215 {offsets = [0, 256], sizes = [8, 128], strides = [1, 1]} : vector<8x384xf32> to vector<8x128xf32>
    %235 = vector.extract_strided_slice %217 {offsets = [0, 256], sizes = [8, 128], strides = [1, 1]} : vector<8x384xf32> to vector<8x128xf32>
    %236 = arith.addf %235, %12 : vector<8x128xf32>
    %237 = arith.mulf %225, %236 : vector<8x128xf32>
    %238 = arith.addf %234, %237 : vector<8x128xf32>
    %239 = math.tanh %238 : vector<8x128xf32>
    %240 = arith.subf %209, %239 : vector<8x128xf32>
    %241 = arith.mulf %233, %240 : vector<8x128xf32>
    %242 = arith.addf %239, %241 : vector<8x128xf32>
    %243 = arith.index_cast %213 : i32 to index
    %c0_67 = arith.constant 0 : index
    %244 = vector.load %arg7[%243, %c0_67] : memref<64x128xf32, #tpu.memory_space<vmem>>, vector<8x128xf32>
    tpu.vector_store %arg7[%243, %c0_67], %242 {strides = array<i32>} : memref<64x128xf32, #tpu.memory_space<vmem>>, vector<8x128xf32>,
    %c7_i32 = arith.constant 7 : i32
    %c8_i32_68 = arith.constant 8 : i32
    %245 = arith.muli %c7_i32, %c8_i32_68 : i32
    %246 = tpu.assume_multiple %245, 8 : i32
    %247 = arith.index_cast %246 : i32 to index
    %c0_69 = arith.constant 0 : index
    %248 = vector.load %arg10[%247, %c0_69] : memref<64x384xf32, #tpu.memory_space<vmem>>, vector<8x384xf32>
    %c0_70 = arith.constant 0 : index
    %c0_71 = arith.constant 0 : index
    %249 = vector.load %arg4[%c0_70, %c0_71] : memref<128x384xf32, #tpu.memory_space<vmem>>, vector<128x384xf32>
    %cst_72 = arith.constant dense<0.000000e+00> : vector<8x384xf32>
    %250 = tpu.matmul %242, %249, %cst_72 {dimension_numbers = #tpu.dot_dimension_numbers<[1], [0], [0], [1], [0, 0, 1, 1], [], []>} : vector<8x128xf32>, vector<128x384xf32>, vector<8x384xf32> -> vector<8x384xf32>
    %251 = vector.extract_strided_slice %248 {offsets = [0, 0], sizes = [8, 128], strides = [1, 1]} : vector<8x384xf32> to vector<8x128xf32>
    %252 = vector.extract_strided_slice %250 {offsets = [0, 0], sizes = [8, 128], strides = [1, 1]} : vector<8x384xf32> to vector<8x128xf32>
    %253 = arith.addf %251, %252 : vector<8x128xf32>
    %254 = arith.negf %253 : vector<8x128xf32>
    %255 = math.exp %254 : vector<8x128xf32>
    %cst_73 = arith.constant 1.000000e+00 : f32
    %256 = vector.broadcast %cst_73 : f32 to vector<8x128xf32>
    %257 = arith.addf %256, %255 : vector<8x128xf32>
    %258 = arith.divf %256, %257 : vector<8x128xf32>
    %259 = vector.extract_strided_slice %248 {offsets = [0, 128], sizes = [8, 128], strides = [1, 1]} : vector<8x384xf32> to vector<8x128xf32>
    %260 = vector.extract_strided_slice %250 {offsets = [0, 128], sizes = [8, 128], strides = [1, 1]} : vector<8x384xf32> to vector<8x128xf32>
    %261 = arith.addf %259, %260 : vector<8x128xf32>
    %262 = arith.negf %261 : vector<8x128xf32>
    %263 = math.exp %262 : vector<8x128xf32>
    %cst_74 = arith.constant 1.000000e+00 : f32
    %264 = vector.broadcast %cst_74 : f32 to vector<8x128xf32>
    %265 = arith.addf %264, %263 : vector<8x128xf32>
    %266 = arith.divf %264, %265 : vector<8x128xf32>
    %267 = vector.extract_strided_slice %248 {offsets = [0, 256], sizes = [8, 128], strides = [1, 1]} : vector<8x384xf32> to vector<8x128xf32>
    %268 = vector.extract_strided_slice %250 {offsets = [0, 256], sizes = [8, 128], strides = [1, 1]} : vector<8x384xf32> to vector<8x128xf32>
    %269 = arith.addf %268, %12 : vector<8x128xf32>
    %270 = arith.mulf %258, %269 : vector<8x128xf32>
    %271 = arith.addf %267, %270 : vector<8x128xf32>
    %272 = math.tanh %271 : vector<8x128xf32>
    %273 = arith.subf %242, %272 : vector<8x128xf32>
    %274 = arith.mulf %266, %273 : vector<8x128xf32>
    %275 = arith.addf %272, %274 : vector<8x128xf32>
    %276 = arith.index_cast %246 : i32 to index
    %c0_75 = arith.constant 0 : index
    %277 = vector.load %arg7[%276, %c0_75] : memref<64x128xf32, #tpu.memory_space<vmem>>, vector<8x128xf32>
    tpu.vector_store %arg7[%276, %c0_75], %275 {strides = array<i32>} : memref<64x128xf32, #tpu.memory_space<vmem>>, vector<8x128xf32>,
    %c8_i32_76 = arith.constant 8 : i32
    %c0_77 = arith.constant 0 : index
    %c0_78 = arith.constant 0 : index
    %278 = vector.load %arg9[%c0_77, %c0_78] : memref<8x128xf32, #tpu.memory_space<vmem>>, vector<8x128xf32>
    tpu.vector_store %arg9[%c0_77, %c0_78], %275 {strides = array<i32>} : memref<8x128xf32, #tpu.memory_space<vmem>>, vector<8x128xf32>,
    %c0_i32_79 = arith.constant 0 : i32
    %279 = arith.cmpi eq, %arg1, %c0_i32_79 : i32
    %280 = arith.extui %279 : i1 to i32
    %c0_i32_80 = arith.constant 0 : i32
    %281 = arith.cmpi ne, %280, %c0_i32_80 : i32
    scf.if %281 {
      %c0_81 = arith.constant 0 : index
      %c0_82 = arith.constant 0 : index
      %282 = vector.load %arg8[%c0_81, %c0_82] : memref<8x128xf32, #tpu.memory_space<vmem>>, vector<8x128xf32>
      tpu.vector_store %arg8[%c0_81, %c0_82], %275 {strides = array<i32>} : memref<8x128xf32, #tpu.memory_space<vmem>>, vector<8x128xf32>,
    } else {
    }
    return
  }
  func.func @transform_0(%arg0: i32, %arg1: i32) -> (i32, i32) {
    %c1_i32 = arith.constant 1 : i32
    %0 = arith.muli %arg0, %c1_i32 : i32
    %1 = arith.addi %0, %arg1 : i32
    %c0_i32 = arith.constant 0 : i32
    %c0_i32_0 = arith.constant 0 : i32
    return %1, %c0_i32 : i32, i32
  }
  func.func @transform_1(%arg0: i32, %arg1: i32) -> (i32, i32) {
    %c0_i32 = arith.constant 0 : i32
    %c0_i32_0 = arith.constant 0 : i32
    %c0_i32_1 = arith.constant 0 : i32
    return %c0_i32, %c0_i32_0 : i32, i32
  }
  func.func @transform_2(%arg0: i32, %arg1: i32) -> (i32, i32) {
    %c0_i32 = arith.constant 0 : i32
    %c0_i32_0 = arith.constant 0 : i32
    %c0_i32_1 = arith.constant 0 : i32
    return %c0_i32, %c0_i32_0 : i32, i32
  }
  func.func @transform_3(%arg0: i32, %arg1: i32) -> (i32, i32) {
    %c0_i32 = arith.constant 0 : i32
    %c0_i32_0 = arith.constant 0 : i32
    %c0_i32_1 = arith.constant 0 : i32
    return %c0_i32, %c0_i32_0 : i32, i32
  }
  func.func @transform_4(%arg0: i32, %arg1: i32) -> (i32, i32) {
    %c0_i32 = arith.constant 0 : i32
    %c0_i32_0 = arith.constant 0 : i32
    %c0_i32_1 = arith.constant 0 : i32
    return %c0_i32, %c0_i32_0 : i32, i32
  }
  func.func @transform_5(%arg0: i32, %arg1: i32) -> (i32, i32) {
    %c1_i32 = arith.constant 1 : i32
    %0 = arith.muli %arg0, %c1_i32 : i32
    %1 = arith.addi %0, %arg1 : i32
    %c0_i32 = arith.constant 0 : i32
    %c0_i32_0 = arith.constant 0 : i32
    return %1, %c0_i32 : i32, i32
  }
  func.func @transform_6(%arg0: i32, %arg1: i32) -> (i32, i32) {
    %c0_i32 = arith.constant 0 : i32
    %c0_i32_0 = arith.constant 0 : i32
    return %arg0, %c0_i32 : i32, i32
  }
}

</mosaic_0001>

<bundles_post_ra>
// kernel: vanilla_gru_forward.2
= control target key start
LH: loop header
LB: loop body
LE: loop exit
PB: predicated region body
PF: predicated region fallthrough
CT: control target
= control target key end

     0   :  { %v4237_v3 = vmov 0.0   ;;  %vm2769_vm0 = vmmov 0   ;;  %s4230_s1 = inlined_call_operand.vmem [shape: f32[128,384], index: 1, kind: input, shape index: {}]   ;;  %s4231_s0 = inlined_call_operand.vmem [shape: f32[64,128], index: 0, kind: input, shape index: {}]   ;;  %s4232_s2 = inlined_call_operand.vmem [shape: f32[128,384], index: 2, kind: input, shape index: {}]   ;;  %s4233_s3 = inlined_call_operand.vmem [shape: f32[1,384], index: 3, kind: input, shape index: {}]   ;;  %s4234_s4 = inlined_call_operand.vmem [shape: f32[1,128], index: 4, kind: input, shape index: {}]   ;;  %s4235_s5 = inlined_call_operand.vmem [shape: f32[64,128], index: 5, kind: output, shape index: {0}]   ;;  %s4236_s6 = inlined_call_operand.vmem [shape: f32[8,128], index: 6, kind: output, shape index: {1}]  }
   0x1   :  { %v117_v0 = vld [vmem:[%s4230_s1 + $0x170] sm:$0xff]  ;;  %v116_v1 = vld [vmem:[%s4230_s1 + $0x168] sm:$0xff]  ;;  %v114_v2 = vld [vmem:[%s4230_s1 + $0x158] sm:$0xff]  ;;  %200 = vmatprep.mubr.f32.mxu0 %v4237_v3 }
   0x2   :  { %136 = vmatprep.subr.mxu0 %v117_v0  ;;  %v113_v4 = vld [vmem:[%s4230_s1 + $0x150] sm:$0xff]  ;;  %v111_v5 = vld [vmem:[%s4230_s1 + $0x140] sm:$0xff]  ;;  %v110_v6 = vld [vmem:[%s4230_s1 + $0x138] sm:$0xff] }
   0x3   :  { %137 = vmatpush1.msra.mxu0 %v116_v1  ;;  %v108_v7 = vld [vmem:[%s4230_s1 + $0x128] sm:$0xff]  ;;  %v107_v8 = vld [vmem:[%s4230_s1 + $0x120] sm:$0xff]  ;;  %v105_v9 = vld [vmem:[%s4230_s1 + $0x110] sm:$0xff] }
   0x4   :  { %138 = vmatprep.subr.mxu0 %v114_v2  ;;  %v104_v10 = vld [vmem:[%s4230_s1 + $0x108] sm:$0xff]  ;;  %v102_v11 = vld [vmem:[%s4230_s1 + $0xf8] sm:$0xff]  ;;  %v101_v12 = vld [vmem:[%s4230_s1 + $0xf0] sm:$0xff] }
   0x5   :  { %139 = vmatpush1.msra.mxu0 %v113_v4  ;;  %v99_v13 = vld [vmem:[%s4230_s1 + $0xe0] sm:$0xff]  ;;  %v118_v14 = vld [vmem:[%s4230_s1 + $0x178] sm:$0xff]  ;;  %v96_v17 = vld [vmem:[%s4230_s1 + $0xc8] sm:$0xff] }
   0x6   :  { %140 = vmatprep.subr.mxu0 %v111_v5  ;;  %v98_v15 = vld [vmem:[%s4230_s1 + $0xd8] sm:$0xff]  ;;  %2361 = vmatprep.subr.mxu1 %v118_v14  ;;  %v115_v16 = vld [vmem:[%s4230_s1 + $0x160] sm:$0xff]  ;;  %v112_v18 = vld [vmem:[%s4230_s1 + $0x148] sm:$0xff] }
   0x7   :  { %141 = vmatpush1.msra.mxu0 %v110_v6  ;;  %2362 = vmatpush3.msra.mxu1 %v118_v14  ;;  %v95_v19 = vld [vmem:[%s4230_s1 + $0xc0] sm:$0xff]  ;;  %v93_v20 = vld [vmem:[%s4230_s1 + $0xb0] sm:$0xff]  ;;  %v92_v22 = vld [vmem:[%s4230_s1 + $0xa8] sm:$0xff] }
   0x8   :  { %142 = vmatprep.subr.mxu0 %v108_v7  ;;  %2363 = vmatprep.subr.mxu1 %v115_v16  ;;  %v109_v21 = vld [vmem:[%s4230_s1 + $0x130] sm:$0xff]  ;;  %v90_v23 = vld [vmem:[%s4230_s1 + $0x98] sm:$0xff]  ;;  %v87_v26 = vld [vmem:[%s4230_s1 + $0x80] sm:$0xff] }
   0x9   :  { %143 = vmatpush1.msra.mxu0 %v107_v8  ;;  %2364 = vmatpush3.msra.mxu1 %v115_v16  ;;  %v106_v24 = vld [vmem:[%s4230_s1 + $0x118] sm:$0xff]  ;;  %v89_v25 = vld [vmem:[%s4230_s1 + $0x90] sm:$0xff]  ;;  %v103_v27 = vld [vmem:[%s4230_s1 + $0x100] sm:$0xff] }
   0xa   :  { %144 = vmatprep.subr.mxu0 %v105_v9  ;;  %2365 = vmatprep.subr.mxu1 %v112_v18  ;;  %v86_v28 = vld [vmem:[%s4230_s1 + $0x78] sm:$0xff]  ;;  %v84_v29 = vld [vmem:[%s4230_s1 + $0x68] sm:$0xff]  ;;  %v83_v31 = vld [vmem:[%s4230_s1 + $0x60] sm:$0xff] }
   0xb   :  { %145 = vmatpush1.msra.mxu0 %v104_v10  ;;  %2366 = vmatpush3.msra.mxu1 %v112_v18  ;;  %v100_v30 = vld [vmem:[%s4230_s1 + $0xe8] sm:$0xff]  ;;  %v81_v32 = vld [vmem:[%s4230_s1 + $0x50] sm:$0xff]  ;;  %v78_v35 = vld [vmem:[%s4230_s1 + $0x38] sm:$0xff] }
   0xc   :  { %146 = vmatprep.subr.mxu0 %v102_v11  ;;  %2367 = vmatprep.subr.mxu1 %v109_v21  ;;  %v97_v33 = vld [vmem:[%s4230_s1 + $0xd0] sm:$0xff]  ;;  %v80_v34 = vld [vmem:[%s4230_s1 + $0x48] sm:$0xff]  ;;  %v94_v36 = vld [vmem:[%s4230_s1 + $0xb8] sm:$0xff] }
   0xd   :  { %147 = vmatpush1.msra.mxu0 %v101_v12  ;;  %2368 = vmatpush3.msra.mxu1 %v109_v21  ;;  %v77_v37 = vld [vmem:[%s4230_s1 + $0x30] sm:$0xff]  ;;  %v75_v38 = vld [vmem:[%s4230_s1 + $0x20] sm:$0xff]  ;;  %v74_v40 = vld [vmem:[%s4230_s1 + $0x18] sm:$0xff] }
   0xe   :  { %148 = vmatprep.subr.mxu0 %v99_v13  ;;  %2369 = vmatprep.subr.mxu1 %v106_v24  ;;  %v91_v39 = vld [vmem:[%s4230_s1 + $0xa0] sm:$0xff]  ;;  %v72_v41 = vld [vmem:[%s4230_s1 + $0x8] sm:$0xff]  ;;  %v2943_v45 = vld [vmem:[%s4232_s2 + $0x170] sm:$0xff] }
   0xf   :  { %149 = vmatpush1.msra.mxu0 %v98_v15  ;;  %2370 = vmatpush3.msra.mxu1 %v106_v24  ;;  %v88_v42 = vld [vmem:[%s4230_s1 + $0x88] sm:$0xff]  ;;  %v71_v43 = vld [vmem:[%s4230_s1] sm:$0xff]  ;;  %v2953_v47 = vld [vmem:[%s4232_s2 + $0x158] sm:$0xff] }
  0x10   :  { %150 = vmatprep.subr.mxu0 %v96_v17  ;;  %2371 = vmatprep.subr.mxu1 %v103_v27  ;;  %v2938_v44 = vld [vmem:[%s4231_s0] sm:$0xff]  ;;  %v2948_v46 = vld [vmem:[%s4232_s2 + $0x168] sm:$0xff]  ;;  %v85_v48 = vld [vmem:[%s4230_s1 + $0x70] sm:$0xff] }
  0x11   :  { %151 = vmatpush1.msra.mxu0 %v95_v19  ;;  %2372 = vmatpush3.msra.mxu1 %v103_v27  ;;  %v2963_v49 = vld [vmem:[%s4232_s2 + $0x150] sm:$0xff]  ;;  %v2970_v50 = vld [vmem:[%s4231_s0 + $0x8] sm:$0xff]  ;;  %v2975_v51 = vld [vmem:[%s4232_s2 + $0x140] sm:$0xff] }
  0x12   :  { %152 = vmatprep.subr.mxu0 %v93_v20  ;;  %2373 = vmatprep.subr.mxu1 %v100_v30  ;;  %v2981_v52 = vld [vmem:[%s4232_s2 + $0x138] sm:$0xff]  ;;  %v2987_v53 = vld [vmem:[%s4232_s2 + $0x128] sm:$0xff]  ;;  %v2997_v55 = vld [vmem:[%s4232_s2 + $0x120] sm:$0xff] }
  0x13   :  { %153 = vmatpush1.msra.mxu0 %v92_v22  ;;  %2374 = vmatpush3.msra.mxu1 %v100_v30  ;;  %v82_v54 = vld [vmem:[%s4230_s1 + $0x58] sm:$0xff]  ;;  %v3004_v56 = vld [vmem:[%s4231_s0 + $0x10] sm:$0xff]  ;;  %v3015_v58 = vld [vmem:[%s4232_s2 + $0x108] sm:$0xff] }
  0x14   :  { %154 = vmatprep.subr.mxu0 %v90_v23  ;;  %2375 = vmatprep.subr.mxu1 %v97_v33  ;;  %v3009_v57 = vld [vmem:[%s4232_s2 + $0x110] sm:$0xff]  ;;  %v3021_v59 = vld [vmem:[%s4232_s2 + $0xf8] sm:$0xff]  ;;  %v79_v60 = vld [vmem:[%s4230_s1 + $0x40] sm:$0xff] }
  0x15   :  { %155 = vmatpush1.msra.mxu0 %v89_v25  ;;  %2376 = vmatpush3.msra.mxu1 %v97_v33  ;;  %v3031_v61 = vld [vmem:[%s4232_s2 + $0xf0] sm:$0xff]  ;;  %v3038_v62 = vld [vmem:[%s4231_s0 + $0x18] sm:$0xff]  ;;  %v3043_v63 = vld [vmem:[%s4232_s2 + $0xe0] sm:$0xff] }
  0x16   :  { %156 = vmatprep.subr.mxu0 %v87_v26  ;;  %2377 = vmatprep.subr.mxu1 %v94_v36  ;;  %v3049_v0 = vld [vmem:[%s4232_s2 + $0xd8] sm:$0xff]  ;;  %v3055_v1 = vld [vmem:[%s4232_s2 + $0xc8] sm:$0xff]  ;;  %v3065_v4 = vld [vmem:[%s4232_s2 + $0xc0] sm:$0xff] }
  0x17   :  { %157 = vmatpush1.msra.mxu0 %v86_v28  ;;  %2378 = vmatpush3.msra.mxu1 %v94_v36  ;;  %v76_v2 = vld [vmem:[%s4230_s1 + $0x28] sm:$0xff]  ;;  %v3072_v5 = vld [vmem:[%s4231_s0 + $0x20] sm:$0xff]  ;;  %v3077_v6 = vld [vmem:[%s4232_s2 + $0xb0] sm:$0xff] }
  0x18   :  { %158 = vmatprep.subr.mxu0 %v84_v29  ;;  %2379 = vmatprep.subr.mxu1 %v91_v39  ;;  %v3083_v7 = vld [vmem:[%s4232_s2 + $0xa8] sm:$0xff]  ;;  %v3089_v8 = vld [vmem:[%s4232_s2 + $0x98] sm:$0xff]  ;;  %v73_v9 = vld [vmem:[%s4230_s1 + $0x10] sm:$0xff] }
  0x19   :  { %159 = vmatpush1.msra.mxu0 %v83_v31  ;;  %2380 = vmatpush3.msra.mxu1 %v91_v39  ;;  %v3099_v10 = vld [vmem:[%s4232_s2 + $0x90] sm:$0xff]  ;;  %v68_v11 = vld [vmem:[%s4231_s0 + $0x28] sm:$0xff]  ;;  %v3109_v12 = vld [vmem:[%s4232_s2 + $0x80] sm:$0xff] }
  0x1a   :  { %160 = vmatprep.subr.mxu0 %v81_v32  ;;  %2381 = vmatprep.subr.mxu1 %v88_v42  ;;  %v3115_v13 = vld [vmem:[%s4232_s2 + $0x78] sm:$0xff]  ;;  %v3121_v14 = vld [vmem:[%s4232_s2 + $0x68] sm:$0xff]  ;;  %v3127_v15 = vld [vmem:[%s4232_s2 + $0x60] sm:$0xff] }
  0x1b   :  { %161 = vmatpush1.msra.mxu0 %v80_v34  ;;  %2382 = vmatpush3.msra.mxu1 %v88_v42  ;;  %v69_v16 = vld [vmem:[%s4231_s0 + $0x30] sm:$0xff]  ;;  %v3143_v18 = vld [vmem:[%s4232_s2 + $0x48] sm:$0xff]  ;;  %v3150_v19 = vld [vmem:[%s4232_s2 + $0x38] sm:$0xff]  ;;  %v121_v42 = vlaneseq }
  0x1c   :  { %162 = vmatprep.subr.mxu0 %v78_v35  ;;  %2383 = vmatprep.subr.mxu1 %v85_v48  ;;  %v3137_v17 = vld [vmem:[%s4232_s2 + $0x50] sm:$0xff]  ;;  %v3162_v21 = vld [vmem:[%s4232_s2 + $0x178] sm:$0xff]  ;;  %v3172_v23 = vld [vmem:[%s4232_s2 + $0x20] sm:$0xff] }
  0x1d   :  { %163 = vmatpush1.msra.mxu0 %v77_v37  ;;  %2384 = vmatpush3.msra.mxu1 %v85_v48  ;;  %v3157_v20 = vld [vmem:[%s4232_s2 + $0x30] sm:$0xff]  ;;  %v70_v22 = vld [vmem:[%s4231_s0 + $0x38] sm:$0xff]  ;;  %v3185_v25 = vld [vmem:[%s4232_s2 + $0x8] sm:$0xff] }
  0x1e   :  { %164 = vmatprep.subr.mxu0 %v75_v38  ;;  %2385 = vmatprep.subr.mxu1 %v82_v54  ;;  %v3178_v24 = vld [vmem:[%s4232_s2 + $0x18] sm:$0xff]  ;;  %4256 = vst [vmem:[#allocation4_spill] sm:$0xff] %v3185_v25  ;;  %v3192_v26 = vld [vmem:[%s4232_s2] sm:$0xff]  ;;  %v3206_v28 = vld [vmem:[%s4232_s2 + $0x148] sm:$0xff] }
  0x1f   :  { %165 = vmatpush1.msra.mxu0 %v74_v40  ;;  %2386 = vmatpush3.msra.mxu1 %v82_v54  ;;  %4257 = vst [vmem:[#allocation5_spill] sm:$0xff] %v3192_v26  ;;  %v3197_v27 = vld [vmem:[%s4232_s2 + $0x160] sm:$0xff]  ;;  %v3215_v29 = vld [vmem:[%s4232_s2 + $0x130] sm:$0xff]  ;;  %v3223_v30 = vld [vmem:[%s4232_s2 + $0x118] sm:$0xff] }
  0x20   :  { %166 = vmatprep.subr.mxu0 %v72_v41  ;;  %2387 = vmatprep.subr.mxu1 %v79_v60  ;;  %v3232_v31 = vld [vmem:[%s4232_s2 + $0x100] sm:$0xff]  ;;  %v3241_v32 = vld [vmem:[%s4232_s2 + $0xe8] sm:$0xff]  ;;  %v3248_v33 = vld [vmem:[%s4232_s2 + $0xd0] sm:$0xff] }
  0x21   :  { %167 = vmatpush1.msra.mxu0 %v71_v43  ;;  %2388 = vmatpush3.msra.mxu1 %v79_v60  ;;  %v3257_v34 = vld [vmem:[%s4232_s2 + $0xb8] sm:$0xff]  ;;  %v3266_v35 = vld [vmem:[%s4232_s2 + $0xa0] sm:$0xff]  ;;  %v3275_v36 = vld [vmem:[%s4232_s2 + $0x88] sm:$0xff]  ;;  %v122_v43 = vshrl.u32 %v121_v42, 7 }
  0x22   :  { %201 = vmatmul.mubr.f32.vlgmr.msra.gmra.mxu0 %v2938_v44  ;;  %440 = vmatprep.subr.mxu0 %v2943_v45  ;;  %v3284_v37 = vld [vmem:[%s4232_s2 + $0x70] sm:$0xff]  ;;  %v3293_v38 = vld [vmem:[%s4232_s2 + $0x58] sm:$0xff]  ;;  %v3302_v39 = vld [vmem:[%s4232_s2 + $0x40] sm:$0xff] }
  0x23   :  { %441 = vmatpush1.msra.mxu0 %v2948_v46  ;;  %206 = vmatprep.mubr.f32.mxu0 %v4237_v3  ;;  %v3311_v40 = vld [vmem:[%s4232_s2 + $0x28] sm:$0xff]  ;;  %v3320_v41 = vld [vmem:[%s4232_s2 + $0x10] sm:$0xff] }
  0x24   :  { %442 = vmatprep.subr.mxu0 %v2953_v47  ;;  %2389 = vmatprep.subr.mxu1 %v76_v2  ;;  %4258 = vst [vmem:[#allocation6_spill] sm:$0xff] %v3311_v40  ;;  %4259 = vst [vmem:[#allocation7_spill] sm:$0xff] %v3320_v41 }
  0x25   :  { %443 = vmatpush1.msra.mxu0 %v2963_v49  ;;  %2390 = vmatpush3.msra.mxu1 %v76_v2 }
  0x26   :  { %207 = vmatmul.mubr.f32.gmra.mxu0 %v2970_v50  ;;  %444 = vmatprep.subr.mxu0 %v2975_v51 }
  0x27   :  { %445 = vmatpush1.msra.mxu0 %v2981_v52  ;;  %212 = vmatprep.mubr.f32.mxu0 %v4237_v3 }
  0x28   :  { %446 = vmatprep.subr.mxu0 %v2987_v53  ;;  %2391 = vmatprep.subr.mxu1 %v73_v9 }
  0x29   :  { %447 = vmatpush1.msra.mxu0 %v2997_v55  ;;  %2392 = vmatpush3.msra.mxu1 %v73_v9 }
  0x2a   :  { %213 = vmatmul.mubr.f32.gmra.mxu0 %v3004_v56  ;;  %448 = vmatprep.subr.mxu0 %v3009_v57 }
  0x2b   :  { %449 = vmatpush1.msra.mxu0 %v3015_v58  ;;  %218 = vmatprep.mubr.f32.mxu0 %v4237_v3 }
  0x2c   :  { %450 = vmatprep.subr.mxu0 %v3021_v59  ;;  %2393 = vmatprep.mubr.f32.mxu1 %v2938_v44  ;;  %v123_v44 = vsub.s32 0, %v122_v43 }
  0x2d   :  { %451 = vmatpush1.msra.mxu0 %v3031_v61  ;;  %2405 = vmatprep.subr.mxu1 %v4237_v3 }
  0x2e   :  { %219 = vmatmul.mubr.f32.gmra.mxu0 %v3038_v62  ;;  %452 = vmatprep.subr.mxu0 %v3043_v63 }
  0x2f   :  { %453 = vmatpush1.msra.mxu0 %v3049_v0  ;;  %224 = vmatprep.mubr.f32.mxu0 %v4237_v3 }
  0x30   :  { %454 = vmatprep.subr.mxu0 %v3055_v1  ;;  %2394 = vmatmul.mubr.f32.vlgmr.msra.gmra.mxu1 %v2970_v50  ;;  %v127_v50 = vsub.s32 1, %v122_v43 }
  0x31   :  { %455 = vmatpush1.msra.mxu0 %v3065_v4  ;;  %2406 = vmatpush3.msra.mxu1 %v3162_v21 }
  0x32   :  { %225 = vmatmul.mubr.f32.gmra.mxu0 %v3072_v5  ;;  %456 = vmatprep.subr.mxu0 %v3077_v6 }
  0x33   :  { %457 = vmatpush1.msra.mxu0 %v3083_v7  ;;  %230 = vmatprep.mubr.f32.mxu0 %v4237_v3 }
  0x34   :  { %458 = vmatprep.subr.mxu0 %v3089_v8  ;;  %2407 = vmatprep.subr.mxu1 %v4237_v3 }
  0x35   :  { %459 = vmatpush1.msra.mxu0 %v3099_v10  ;;  %2408 = vmatpush3.msra.mxu1 %v3197_v27 }
  0x36   :  { %231 = vmatmul.mubr.f32.gmra.mxu0 %v68_v11  ;;  %460 = vmatprep.subr.mxu0 %v3109_v12 }
  0x37   :  { %461 = vmatpush1.msra.mxu0 %v3115_v13  ;;  %236 = vmatprep.mubr.f32.mxu0 %v4237_v3 }
  0x38   :  { %462 = vmatprep.subr.mxu0 %v3121_v14  ;;  %2409 = vmatprep.subr.mxu1 %v4237_v3 }
  0x39   :  { %463 = vmatpush1.msra.mxu0 %v3127_v15  ;;  %2410 = vmatpush3.msra.mxu1 %v3206_v28 }
  0x3a   :  { %237 = vmatmul.mubr.f32.gmra.mxu0 %v69_v16  ;;  %464 = vmatprep.subr.mxu0 %v3137_v17 }
  0x3b   :  { %465 = vmatpush1.msra.mxu0 %v3143_v18  ;;  %242 = vmatprep.mubr.f32.mxu0 %v4237_v3 }
  0x3c   :  { %466 = vmatprep.subr.mxu0 %v3150_v19  ;;  %2396 = vmatprep.mubr.f32.mxu1 %v3004_v56 }
  0x3d   :  { %467 = vmatpush1.msra.mxu0 %v3157_v20  ;;  %2411 = vmatprep.subr.mxu1 %v4237_v3 }
  0x3e   :  { %243 = vmatmul.mubr.f32.gmra.mxu0 %v70_v22  ;;  %468 = vmatprep.subr.mxu0 %v3172_v23 }
  0x3f   :  { %469 = vmatpush1.msra.mxu0 %v3178_v24  ;;  %504 = vmatprep.mubr.f32.mxu0 %v4237_v3 }
  0x40   :  { %470 = vmatprep.subr.mxu0 %v3185_v25  ;;  %2397 = vmatmul.mubr.f32.gmra.mxu1 %v3038_v62 }
  0x41   :  { %471 = vmatpush1.msra.mxu0 %v3192_v26  ;;  %2412 = vmatpush3.msra.mxu1 %v3215_v29 }
  0x42   :  { %505 = vmatmul.mubr.f32.vlgmr.msra.gmra.mxu0 %v4237_v3  ;;  %2399 = vmatprep.mubr.f32.mxu1 %v3072_v5 }
  0x43   :  { %2413 = vmatprep.subr.mxu1 %v4237_v3  ;;  %657 = vmatprep.subr.mxu0 %v2943_v45 }
  0x44   :  { %2414 = vmatpush3.msra.mxu1 %v3223_v30  ;;  %658 = vmatpush1.msra.mxu0 %v2948_v46 }
  0x45   :  { %2415 = vmatprep.subr.mxu1 %v4237_v3  ;;  %2400 = vmatmul.mubr.f32.gmra.mxu1 %v68_v11 }
  0x46   :  { %2416 = vmatpush3.msra.mxu1 %v3232_v31  ;;  %2402 = vmatprep.mubr.f32.mxu1 %v69_v16 }
  0x47   :  { %2417 = vmatprep.subr.mxu1 %v4237_v3  ;;  %659 = vmatprep.subr.mxu0 %v2953_v47 }
  0x48   :  { %2418 = vmatpush3.msra.mxu1 %v3241_v32  ;;  %660 = vmatpush1.msra.mxu0 %v2963_v49 }
  0x49   :  { %2419 = vmatprep.subr.mxu1 %v4237_v3  ;;  %2403 = vmatmul.mubr.f32.gmra.mxu1 %v70_v22 }
  0x4a   :  { %2420 = vmatpush3.msra.mxu1 %v3248_v33  ;;  %2437 = vmatprep.mubr.msk.f32.mxu1 %vm2769_vm0, %v4237_v3 }
  0x4b   :  { %2421 = vmatprep.subr.mxu1 %v4237_v3  ;;  %661 = vmatprep.subr.mxu0 %v2975_v51 }
  0x4c   :  { %2422 = vmatpush3.msra.mxu1 %v3257_v34  ;;  %662 = vmatpush1.msra.mxu0 %v2981_v52 }
  0x4d   :  { %2423 = vmatprep.subr.mxu1 %v4237_v3  ;;  %663 = vmatprep.subr.mxu0 %v2987_v53 }
  0x4e   :  { %2424 = vmatpush3.msra.mxu1 %v3266_v35  ;;  %664 = vmatpush1.msra.mxu0 %v2997_v55 }
  0x4f   :  { %2425 = vmatprep.subr.mxu1 %v4237_v3  ;;  %665 = vmatprep.subr.mxu0 %v3009_v57 }
  0x50   :  { %2426 = vmatpush3.msra.mxu1 %v3275_v36  ;;  %666 = vmatpush1.msra.mxu0 %v3015_v58 }
  0x51   :  { %2427 = vmatprep.subr.mxu1 %v4237_v3  ;;  %667 = vmatprep.subr.mxu0 %v3021_v59 }
  0x52   :  { %2428 = vmatpush3.msra.mxu1 %v3284_v37  ;;  %668 = vmatpush1.msra.mxu0 %v3031_v61 }
  0x53   :  { %2429 = vmatprep.subr.mxu1 %v4237_v3  ;;  %669 = vmatprep.subr.mxu0 %v3043_v63 }
  0x54   :  { %2430 = vmatpush3.msra.mxu1 %v3293_v38  ;;  %670 = vmatpush1.msra.mxu0 %v3049_v0 }
  0x55   :  { %2431 = vmatprep.subr.mxu1 %v4237_v3  ;;  %671 = vmatprep.subr.mxu0 %v3055_v1 }
  0x56   :  { %2432 = vmatpush3.msra.mxu1 %v3302_v39  ;;  %672 = vmatpush1.msra.mxu0 %v3065_v4 }
  0x57   :  { %2433 = vmatprep.subr.mxu1 %v4237_v3  ;;  %673 = vmatprep.subr.mxu0 %v3077_v6 }
  0x58   :  { %2434 = vmatpush3.msra.mxu1 %v3311_v40  ;;  %674 = vmatpush1.msra.mxu0 %v3083_v7 }
  0x59   :  { %2435 = vmatprep.subr.mxu1 %v4237_v3  ;;  %675 = vmatprep.subr.mxu0 %v3089_v8 }
  0x5a   :  { %2436 = vmatpush3.msra.mxu1 %v3320_v41  ;;  %676 = vmatpush1.msra.mxu0 %v3099_v10 }
  0x5b   :  { %2438 = vmatmul.mubr.f32.vlgmr.msra.gmra.mxu1 %v4237_v3  ;;  %2440 = vmatprep.subr.mxu1 %v4237_v3 }
  0x5c   :  { %2441 = vmatpush3.msra.mxu1 %v3162_v21  ;;  %677 = vmatprep.subr.mxu0 %v3109_v12 }
  0x5d   :  { %2442 = vmatprep.subr.mxu1 %v4237_v3  ;;  %678 = vmatpush1.msra.mxu0 %v3115_v13 }
  0x5e   :  { %2443 = vmatpush3.msra.mxu1 %v3197_v27  ;;  %679 = vmatprep.subr.mxu0 %v3121_v14 }
  0x5f   :  { %2444 = vmatprep.subr.mxu1 %v4237_v3  ;;  %680 = vmatpush1.msra.mxu0 %v3127_v15 }
  0x60   :  { %2445 = vmatpush3.msra.mxu1 %v3206_v28  ;;  %681 = vmatprep.subr.mxu0 %v3137_v17 }
  0x61   :  { %2446 = vmatprep.subr.mxu1 %v4237_v3  ;;  %682 = vmatpush1.msra.mxu0 %v3143_v18 }
  0x62   :  { %2447 = vmatpush3.msra.mxu1 %v3215_v29  ;;  %683 = vmatprep.subr.mxu0 %v3150_v19 }
  0x63   :  { %2448 = vmatprep.subr.mxu1 %v4237_v3  ;;  %684 = vmatpush1.msra.mxu0 %v3157_v20 }
  0x64   :  { %2449 = vmatpush3.msra.mxu1 %v3223_v30  ;;  %685 = vmatprep.subr.mxu0 %v3172_v23 }
  0x65   :  { %2450 = vmatprep.subr.mxu1 %v4237_v3  ;;  %686 = vmatpush1.msra.mxu0 %v3178_v24 }
  0x66   :  { %2451 = vmatpush3.msra.mxu1 %v3232_v31  ;;  %687 = vmatprep.subr.mxu0 %v3185_v25 }
  0x67   :  { %2452 = vmatprep.subr.mxu1 %v4237_v3  ;;  %688 = vmatpush1.msra.mxu0 %v3192_v26 }
  0x68   :  { %2453 = vmatpush3.msra.mxu1 %v3241_v32  ;;  %721 = vmatprep.mubr.f32.mxu0 %v4237_v3 }
  0x69   :  { %2454 = vmatprep.subr.mxu1 %v4237_v3  ;;  %2472 = vmatprep.mubr.msk.f32.mxu1 %vm2769_vm0, %v4237_v3 }
  0x6a   :  { %2455 = vmatpush3.msra.mxu1 %v3248_v33  ;;  %875 = vmatprep.subr.mxu0 %v2943_v45  ;;  %v119_v45 = vld [vmem:[%s4233_s3] sm:$0x7] }
  0x6b   :  { %2456 = vmatprep.subr.mxu1 %v4237_v3  ;;  %v124_v56 = vrot.slane %v119_v45, %v123_v44  ;;  %v128_v62 = vrot.slane %v119_v45, %v127_v50 }
  0x6c   :  { %2457 = vmatpush3.msra.mxu1 %v3257_v34 }
  0x6d   :  { %2458 = vmatprep.subr.mxu1 %v4237_v3 }
  0x6e   :  { %2459 = vmatpush3.msra.mxu1 %v3266_v35 }
  0x6f   :  { %2460 = vmatprep.subr.mxu1 %v4237_v3 }
  0x70   :  { %2461 = vmatpush3.msra.mxu1 %v3275_v36 }
  0x71   :  { %2462 = vmatprep.subr.mxu1 %v4237_v3 }
  0x72   :  { %2463 = vmatpush3.msra.mxu1 %v3284_v37 }
  0x73   :  { %2464 = vmatprep.subr.mxu1 %v4237_v3 }
  0x74   :  { %2465 = vmatpush3.msra.mxu1 %v3293_v38 }
  0x75   :  { %2466 = vmatprep.subr.mxu1 %v4237_v3 }
  0x76   :  { %2467 = vmatpush3.msra.mxu1 %v3302_v39 }
  0x77   :  { %2468 = vmatprep.subr.mxu1 %v4237_v3 }
  0x78   :  { %2469 = vmatpush3.msra.mxu1 %v3311_v40 }
  0x79   :  { %2470 = vmatprep.subr.mxu1 %v4237_v3 }
  0x7a   :  { %2471 = vmatpush3.msra.mxu1 %v3320_v41 }
  0x7b   :  { %2475 = vmatprep.subr.mxu1 %v4237_v3 }
  0xe2   :  { %v202_v48 = vpop.f32.mrf.mxu0 }
  0xe4   :  { %v204_v54 = vpop.f32.mrf.mxu0 }
  0xe6   :  { %v208_v60 = vpop.f32.mrf.mxu0 }
  0xe7   :  { %v3382_v2 = vadd.f32 %v208_v60, %v124_v56 }
  0xe8   :  { %v210_v5 = vpop.f32.mrf.mxu0 }
  0xe9   :  { %4260 = vst [vmem:[#allocation8_spill] sm:$0xff] %v3382_v2  ;;  %v3384_v9 = vadd.f32 %v210_v5, %v128_v62  ;;  %v131_v5 = vsub.s32 2, %v122_v43 }
  0xea   :  { %v214_v11 = vpop.f32.mrf.mxu0 }
  0xeb   :  { %4261 = vst [vmem:[#allocation9_spill] sm:$0xff] %v3384_v9  ;;  %v3386_v16 = vadd.f32 %v214_v11, %v124_v56 }
  0xec   :  { %v216_v22 = vpop.f32.mrf.mxu0 }
  0xed   :  { %4262 = vst [vmem:[#allocation10_spill] sm:$0xff] %v3386_v16  ;;  %v3388_v42 = vadd.f32 %v216_v22, %v128_v62  ;;  %v132_v22 = vrot.slane %v119_v45, %v131_v5 }
  0xee   :  { %v220_v3 = vpop.f32.mrf.mxu0 }
  0xef   :  { %4263 = vst [vmem:[#allocation11_spill] sm:$0xff] %v3388_v42  ;;  %v3390_v41 = vadd.f32 %v220_v3, %v124_v56 }
  0xf0   :  { %v222_v26 = vpop.f32.mrf.mxu0 }
  0xf1   :  { %4264 = vst [vmem:[#allocation12_spill] sm:$0xff] %v3390_v41  ;;  %v3392_v25 = vadd.f32 %v222_v26, %v128_v62  ;;  %v2395_v26 = vpop.f32.mrf.mxu1 }
  0xf2   :  { %v226_v44 = vpop.f32.mrf.mxu0 }
  0xf3   :  { %4265 = vst [vmem:[#allocation13_spill] sm:$0xff] %v3392_v25  ;;  %v3394_v40 = vadd.f32 %v226_v44, %v124_v56  ;;  %v3406_v44 = vadd.f32 %v2395_v26, %v132_v22 }
  0xf4   :  { %v228_v50 = vpop.f32.mrf.mxu0 }
  0xf5   :  { %4266 = vst [vmem:[#allocation14_spill] sm:$0xff] %v3394_v40  ;;  %v3396_v60 = vadd.f32 %v228_v50, %v128_v62  ;;  %4272 = vst [vmem:[#allocation20_spill] sm:$0xff] %v3406_v44 }
  0xf6   :  { %v232_v9 = vpop.f32.mrf.mxu0 }
  0xf7   :  { %4267 = vst [vmem:[#allocation15_spill] sm:$0xff] %v3396_v60  ;;  %v3398_v2 = vadd.f32 %v232_v9, %v124_v56  ;;  %v203_v60 = vadd.f32 %v202_v48, %v124_v56  ;;  %v205_v48 = vadd.f32 %v204_v54, %v128_v62 }
  0xf8   :  { %v234_v11 = vpop.f32.mrf.mxu0 }
  0xf9   :  { %4268 = vst [vmem:[#allocation16_spill] sm:$0xff] %v3398_v2  ;;  %v3400_v16 = vadd.f32 %v234_v11, %v128_v62  ;;  %v315_v11 = vpop.f32.mrf.mxu1 }
  0xfa   :  { %v238_v42 = vpop.f32.mrf.mxu0 }
  0xfb   :  { %4269 = vst [vmem:[#allocation17_spill] sm:$0xff] %v3400_v16  ;;  %v3402_v3 = vadd.f32 %v238_v42, %v124_v56 }
  0xfc   :  { %v240_v41 = vpop.f32.mrf.mxu0 }
  0xfd   :  { %4270 = vst [vmem:[#allocation18_spill] sm:$0xff] %v3402_v3  ;;  %v3404_v25 = vadd.f32 %v240_v41, %v128_v62 }
  0xfe   :  { %v244_v40 = vpop.f32.mrf.mxu0 }
  0xff   :  { %4271 = vst [vmem:[#allocation19_spill] sm:$0xff] %v3404_v25  ;;  %v3408_v50 = vadd.f32 %v244_v40, %v124_v56 }
 0x100   :  { %v246_v43 = vpop.f32.mrf.mxu0  ;;  %v2398_v45 = vpop.f32.mrf.mxu1 }
 0x101   :  { %4273 = vst [vmem:[#allocation21_spill] sm:$0xff] %v3408_v50  ;;  %v3410_v9 = vadd.f32 %v246_v43, %v128_v62  ;;  %v3412_v42 = vadd.f32 %v2398_v45, %v132_v22 }
 0x102   :  { %v506_v2 = vpop.f32.mrf.mxu0  ;;  %v325_v3 = vpop.f32.mrf.mxu1 }
 0x103   :  { %4274 = vst [vmem:[#allocation22_spill] sm:$0xff] %v3410_v9  ;;  %v581_v16 = vadd.f32 %v506_v2, %v203_v60  ;;  %v3414_v41 = vadd.f32 %v325_v3, %v132_v22  ;;  %v3427_v3 = vld [vmem:[%s4234_s4] ss:$0 sm:$0xff] }
 0x104   :  { %v508_v50 = vpop.f32.mrf.mxu0 }
 0x105   :  { %v2178_v5 = vmul.f32 -1.442695, %v581_v16  ;;  %v2401_v26 = vpop.f32.mrf.mxu1  ;;  %v588_v2 = vadd.f32 %v508_v50, %v205_v48  ;;  %v316_v50 = vadd.f32 %v315_v11, %v132_v22  ;;  %v3643_v11 = vld [vmem:[%s4232_s2 + $0xc0] sm:$0xff] }
 0x106   :  { %v3416_v25 = vadd.f32 %v2401_v26, %v132_v22 }
 0x107   :  { %2687 = vpow2.f32 %v2178_v5  ;;  %v335_v40 = vpop.f32.mrf.mxu1  ;;  %v2179_v45 = vmul.f32 -1.442695, %v588_v2 }
 0x108   :  { %4275 = vst [vmem:[#allocation23_spill] sm:$0xff] %v3416_v25  ;;  %v3418_v44 = vadd.f32 %v335_v40, %v132_v22 }
 0x109   :  { %v2404_v56 = vpop.f32.mrf.mxu1  ;;  %2689 = vpow2.f32 %v2179_v45 }
 0x10a   :  { %4276 = vst [vmem:[#allocation24_spill] sm:$0xff] %v3418_v44  ;;  %v3420_v43 = vadd.f32 %v2404_v56, %v132_v22 }
 0x10b   :  { %v345_v60 = vpop.f32.mrf.mxu1 }
 0x10c   :  { %4277 = vst [vmem:[#allocation25_spill] sm:$0xff] %v3420_v43  ;;  %v3422_v16 = vadd.f32 %v345_v60, %v132_v22  ;;  %v4279_v22 = vmov 0.0  }
 0x10e   :  { %4278 = vst [vmem:[#allocation26_spill] sm:$0xff] %v3422_v16 }
 0x114   :  { %v2688_v9 = vpop.eup %2687 }
 0x115   :  { %v585_v5 = vadd.f32 1.0, %v2688_v9 }
 0x116   :  { %v2690_v62 = vpop.eup %2689 }
 0x117   :  { %2691 = vrcp.f32 %v585_v5  ;;  %v592_v60 = vadd.f32 1.0, %v2690_v62  ;;  %v3679_v62 = vld [vmem:[%s4232_s2 + $0x78] sm:$0xff] }
 0x11b   :  { %v577_v26 = vpop.f32.mrf.mxu1 }
 0x11c   :  { %v595_v54 = vadd.f32 %v3427_v3, %v577_v26  ;;  %v3661_v26 = vld [vmem:[%s4232_s2 + $0x98] sm:$0xff] }
 0x11d   :  { %v2439_v40 = vpop.f32.mrf.mxu1 }
 0x11e   :  { %v3667_v40 = vld [vmem:[%s4232_s2 + $0x90] sm:$0xff] }
 0x124   :  { %v2692_v56 = vpop.eup %2691 }
 0x125   :  { %v596_v48 = vmul.f32 %v2692_v56, %v595_v54  ;;  %v3673_v54 = vld [vmem:[%s4232_s2 + $0x80] sm:$0xff]  ;;  %v3685_v56 = vld [vmem:[%s4232_s2 + $0x68] sm:$0xff] }
 0x127   :  { %v597_v43 = vadd.f32 %v596_v48, %v316_v50  ;;  %v3691_v50 = vld [vmem:[%s4232_s2 + $0x60] sm:$0xff]  ;;  %v3697_v48 = vld [vmem:[%s4232_s2 + $0x50] sm:$0xff] }
 0x129   :  { %2693 = vtanh.f32 %v597_v43  ;;  %v3649_v43 = vld [vmem:[%s4232_s2 + $0xb0] sm:$0xff] }
 0x12a   :  { %2695 = vrcp.f32 %v592_v60  ;;  %v3703_v60 = vld [vmem:[%s4232_s2 + $0x48] sm:$0xff] }
 0x136   :  { %v2694_v9 = vpop.eup %2693 }
 0x137   :  { %v599_v2 = vsub.f32 0.0, %v2694_v9  ;;  %v2696_v45 = vpop.eup %2695 }
 0x139   :  { %v600_v5 = vmul.f32 %v2696_v45, %v599_v2  ;;  %v3715_v2 = vld [vmem:[%s4232_s2 + $0x30] sm:$0xff]  ;;  %v3721_v45 = vld [vmem:[%s4232_s2 + $0x20] sm:$0xff] }
 0x13b   :  { %v3430_v16 = vadd.f32 %v2694_v9, %v600_v5  ;;  %v3709_v9 = vld [vmem:[%s4232_s2 + $0x38] sm:$0xff] }
 0x13c   :  { %v3727_v5 = vld [vmem:[%s4232_s2 + $0x18] sm:$0xff] }
 0x13d   :  { %602 = vst [vmem:[%s4235_s5] sm:$0xff] %v3430_v16  ;;  %722 = vmatmul.mubr.f32.vlgmr.msra.gmra.mxu0 %v3430_v16  ;;  %2473 = vmatmul.mubr.f32.vlgmr.msra.gmra.mxu1 %v3430_v16 }
 0x13e   :  { %876 = vmatpush1.msra.mxu0 %v2948_v46  ;;  %2476 = vmatpush3.msra.mxu1 %v3162_v21  ;;  %v4280_v46 = vld [vmem:[#allocation6_spill] sm:$0xff] }
 0x13f   :  { %877 = vmatprep.subr.mxu0 %v2953_v47  ;;  %2477 = vmatprep.subr.mxu1 %v4279_v22  ;;  %v4281_v47 = vld [vmem:[#allocation4_spill] sm:$0xff] }
 0x140   :  { %878 = vmatpush1.msra.mxu0 %v2963_v49  ;;  %2478 = vmatpush3.msra.mxu1 %v3197_v27  ;;  %v4282_v49 = vld [vmem:[#allocation5_spill] sm:$0xff]  ;;  %4288 = vst [vmem:[#allocation4_spill] sm:$0xff] %v3727_v5 }
 0x141   :  { %879 = vmatprep.subr.mxu0 %v2975_v51  ;;  %2479 = vmatprep.subr.mxu1 %v4279_v22  ;;  %v4283_v51 = vld [vmem:[#allocation7_spill] sm:$0xff] }
 0x142   :  { %880 = vmatpush1.msra.mxu0 %v2981_v52  ;;  %2480 = vmatpush3.msra.mxu1 %v3206_v28 }
 0x143   :  { %881 = vmatprep.subr.mxu0 %v2987_v53  ;;  %2481 = vmatprep.subr.mxu1 %v4279_v22 }
 0x144   :  { %882 = vmatpush1.msra.mxu0 %v2997_v55  ;;  %2482 = vmatpush3.msra.mxu1 %v3215_v29  ;;  %v4284_v55 = vld [vmem:[#allocation8_spill] sm:$0xff] }
 0x145   :  { %883 = vmatprep.subr.mxu0 %v3009_v57  ;;  %2483 = vmatprep.subr.mxu1 %v4279_v22 }
 0x146   :  { %884 = vmatpush1.msra.mxu0 %v3015_v58  ;;  %2484 = vmatpush3.msra.mxu1 %v3223_v30 }
 0x147   :  { %885 = vmatprep.subr.mxu0 %v3021_v59  ;;  %2485 = vmatprep.subr.mxu1 %v4279_v22 }
 0x148   :  { %886 = vmatpush1.msra.mxu0 %v3031_v61  ;;  %2486 = vmatpush3.msra.mxu1 %v3232_v31 }
 0x149   :  { %887 = vmatprep.subr.mxu0 %v3043_v63  ;;  %2487 = vmatprep.subr.mxu1 %v4279_v22  ;;  %v4285_v63 = vld [vmem:[#allocation9_spill] sm:$0xff] }
 0x14a   :  { %888 = vmatpush1.msra.mxu0 %v3049_v0  ;;  %2488 = vmatpush3.msra.mxu1 %v3241_v32 }
 0x14b   :  { %889 = vmatprep.subr.mxu0 %v3055_v1  ;;  %2489 = vmatprep.subr.mxu1 %v4279_v22 }
 0x14c   :  { %890 = vmatpush1.msra.mxu0 %v3065_v4  ;;  %2490 = vmatpush3.msra.mxu1 %v3248_v33 }
 0x14d   :  { %891 = vmatprep.subr.mxu0 %v3077_v6  ;;  %2491 = vmatprep.subr.mxu1 %v4279_v22 }
 0x14e   :  { %892 = vmatpush1.msra.mxu0 %v3083_v7  ;;  %2492 = vmatpush3.msra.mxu1 %v3257_v34 }
 0x14f   :  { %893 = vmatprep.subr.mxu0 %v3089_v8  ;;  %2493 = vmatprep.subr.mxu1 %v4279_v22 }
 0x150   :  { %894 = vmatpush1.msra.mxu0 %v3099_v10  ;;  %2494 = vmatpush3.msra.mxu1 %v3266_v35 }
 0x151   :  { %895 = vmatprep.subr.mxu0 %v3109_v12  ;;  %2495 = vmatprep.subr.mxu1 %v4279_v22 }
 0x152   :  { %896 = vmatpush1.msra.mxu0 %v3115_v13  ;;  %2496 = vmatpush3.msra.mxu1 %v3275_v36  ;;  %v4286_v13 = vld [vmem:[#allocation20_spill] sm:$0xff] }
 0x153   :  { %897 = vmatprep.subr.mxu0 %v3121_v14  ;;  %2497 = vmatprep.subr.mxu1 %v4279_v22 }
 0x154   :  { %898 = vmatpush1.msra.mxu0 %v3127_v15  ;;  %2498 = vmatpush3.msra.mxu1 %v3284_v37 }
 0x155   :  { %899 = vmatprep.subr.mxu0 %v3137_v17  ;;  %2499 = vmatprep.subr.mxu1 %v4279_v22 }
 0x156   :  { %900 = vmatpush1.msra.mxu0 %v3143_v18  ;;  %2500 = vmatpush3.msra.mxu1 %v3293_v38 }
 0x157   :  { %901 = vmatprep.subr.mxu0 %v3150_v19  ;;  %2501 = vmatprep.subr.mxu1 %v4279_v22 }
 0x158   :  { %902 = vmatpush1.msra.mxu0 %v3157_v20  ;;  %2502 = vmatpush3.msra.mxu1 %v3302_v39 }
 0x159   :  { %903 = vmatprep.subr.mxu0 %v3172_v23  ;;  %2503 = vmatprep.subr.mxu1 %v4279_v22 }
 0x15a   :  { %904 = vmatpush1.msra.mxu0 %v3178_v24  ;;  %2504 = vmatpush3.msra.mxu1 %v4280_v46  ;;  %v3561_v24 = vld [vmem:[%s4232_s2 + $0x168] sm:$0xff] }
 0x15b   :  { %905 = vmatprep.subr.mxu0 %v4281_v47  ;;  %2505 = vmatprep.subr.mxu1 %v4279_v22  ;;  %v3739_v47 = vld [vmem:[%s4232_s2] sm:$0xff] }
 0x15c   :  { %906 = vmatpush1.msra.mxu0 %v4282_v49  ;;  %939 = vmatprep.mubr.f32.mxu0 %v4279_v22  ;;  %4290 = vst [vmem:[#allocation7_spill] sm:$0xff] %v3739_v47 }
 0x15d   :  { %2506 = vmatpush3.msra.mxu1 %v4283_v51  ;;  %2507 = vmatprep.mubr.msk.f32.mxu1 %vm2769_vm0, %v4279_v22 }
 0x15e   :  { %2510 = vmatprep.subr.mxu1 %v4279_v22 }
 0x1fd   :  { %v723_v52 = vpop.f32.mrf.mxu0  ;;  %v794_v53 = vpop.f32.mrf.mxu1 }
 0x1fe   :  { %v798_v57 = vadd.f32 %v723_v52, %v4284_v55  ;;  %v812_v8 = vadd.f32 %v3427_v3, %v794_v53  ;;  %v4291_v52 = vld [vmem:[#allocation10_spill] sm:$0xff] }
 0x1ff   :  { %v2474_v58 = vpop.f32.mrf.mxu1  ;;  %v725_v61 = vpop.f32.mrf.mxu0 }
 0x200   :  { %v2180_v59 = vmul.f32 -1.442695, %v798_v57  ;;  %v805_v0 = vadd.f32 %v725_v61, %v4285_v63 }
 0x202   :  { %2697 = vpow2.f32 %v2180_v59  ;;  %v2181_v1 = vmul.f32 -1.442695, %v805_v0  ;;  %v4292_v59 = vld [vmem:[#allocation11_spill] sm:$0xff] }
 0x204   :  { %2699 = vpow2.f32 %v2181_v1 }
 0x20f   :  { %v2698_v4 = vpop.eup %2697 }
 0x210   :  { %v802_v6 = vadd.f32 1.0, %v2698_v4 }
 0x211   :  { %v2700_v7 = vpop.eup %2699 }
 0x212   :  { %2701 = vrcp.f32 %v802_v6  ;;  %v809_v15 = vadd.f32 1.0, %v2700_v7 }
 0x21f   :  { %v2702_v10 = vpop.eup %2701 }
 0x220   :  { %v813_v12 = vmul.f32 %v2702_v10, %v812_v8 }
 0x222   :  { %v814_v14 = vadd.f32 %v813_v12, %v4286_v13 }
 0x224   :  { %2703 = vtanh.f32 %v814_v14 }
 0x225   :  { %2705 = vrcp.f32 %v809_v15 }
 0x231   :  { %v2704_v17 = vpop.eup %2703 }
 0x232   :  { %v816_v18 = vsub.f32 %v3430_v16, %v2704_v17  ;;  %v2706_v19 = vpop.eup %2705  ;;  %v3655_v16 = vld [vmem:[%s4232_s2 + $0xa8] sm:$0xff] }
 0x234   :  { %v817_v20 = vmul.f32 %v2706_v19, %v816_v18  ;;  %v3803_v19 = vld [vmem:[%s4232_s2 + $0x160] sm:$0xff] }
 0x236   :  { %v3509_v23 = vadd.f32 %v2704_v17, %v817_v20  ;;  %v3810_v20 = vld [vmem:[%s4232_s2 + $0x148] sm:$0xff] }
 0x238   :  { %2182 = vst [vmem:[%s4235_s5 + $0x8] sm:$0xff] %v3509_v23  ;;  %940 = vmatmul.mubr.f32.vlgmr.msra.gmra.mxu0 %v3509_v23  ;;  %2508 = vmatmul.mubr.f32.vlgmr.msra.gmra.mxu1 %v3509_v23 }
 0x239   :  { %2511 = vmatpush3.msra.mxu1 %v3162_v21  ;;  %1157 = vmatprep.mubr.f32.mxu0 %v4279_v22  ;;  %v3555_v21 = vld [vmem:[%s4232_s2 + $0x170] sm:$0xff] }
 0x23a   :  { %2512 = vmatprep.subr.mxu1 %v4279_v22  ;;  %2542 = vmatprep.mubr.msk.f32.mxu1 %vm2769_vm0, %v4279_v22  ;;  %4287 = vst [vmem:[#allocation6_spill] sm:$0xff] %v3555_v21 }
 0x23b   :  { %2513 = vmatpush3.msra.mxu1 %v3197_v27  ;;  %1093 = vmatprep.subr.mxu0 %v3555_v21  ;;  %v3567_v27 = vld [vmem:[%s4232_s2 + $0x158] sm:$0xff] }
 0x23c   :  { %2514 = vmatprep.subr.mxu1 %v4279_v22  ;;  %1094 = vmatpush1.msra.mxu0 %v3561_v24 }
 0x23d   :  { %2515 = vmatpush3.msra.mxu1 %v3206_v28  ;;  %1095 = vmatprep.subr.mxu0 %v3567_v27  ;;  %v3573_v28 = vld [vmem:[%s4232_s2 + $0x150] sm:$0xff] }
 0x23e   :  { %2516 = vmatprep.subr.mxu1 %v4279_v22  ;;  %1096 = vmatpush1.msra.mxu0 %v3573_v28 }
 0x23f   :  { %2517 = vmatpush3.msra.mxu1 %v3215_v29  ;;  %v3579_v29 = vld [vmem:[%s4232_s2 + $0x140] sm:$0xff] }
 0x240   :  { %2518 = vmatprep.subr.mxu1 %v4279_v22  ;;  %1097 = vmatprep.subr.mxu0 %v3579_v29 }
 0x241   :  { %2519 = vmatpush3.msra.mxu1 %v3223_v30  ;;  %v3585_v30 = vld [vmem:[%s4232_s2 + $0x138] sm:$0xff] }
 0x242   :  { %2520 = vmatprep.subr.mxu1 %v4279_v22  ;;  %1098 = vmatpush1.msra.mxu0 %v3585_v30 }
 0x243   :  { %2521 = vmatpush3.msra.mxu1 %v3232_v31  ;;  %v3591_v31 = vld [vmem:[%s4232_s2 + $0x128] sm:$0xff] }
 0x244   :  { %2522 = vmatprep.subr.mxu1 %v4279_v22  ;;  %1099 = vmatprep.subr.mxu0 %v3591_v31 }
 0x245   :  { %2523 = vmatpush3.msra.mxu1 %v3241_v32  ;;  %v3597_v32 = vld [vmem:[%s4232_s2 + $0x120] sm:$0xff] }
 0x246   :  { %2524 = vmatprep.subr.mxu1 %v4279_v22  ;;  %1100 = vmatpush1.msra.mxu0 %v3597_v32 }
 0x247   :  { %2525 = vmatpush3.msra.mxu1 %v3248_v33  ;;  %v3603_v33 = vld [vmem:[%s4232_s2 + $0x110] sm:$0xff] }
 0x248   :  { %2526 = vmatprep.subr.mxu1 %v4279_v22  ;;  %1101 = vmatprep.subr.mxu0 %v3603_v33 }
 0x249   :  { %2527 = vmatpush3.msra.mxu1 %v3257_v34  ;;  %v3609_v34 = vld [vmem:[%s4232_s2 + $0x108] sm:$0xff] }
 0x24a   :  { %2528 = vmatprep.subr.mxu1 %v4279_v22  ;;  %1102 = vmatpush1.msra.mxu0 %v3609_v34 }
 0x24b   :  { %2529 = vmatpush3.msra.mxu1 %v3266_v35  ;;  %v3615_v35 = vld [vmem:[%s4232_s2 + $0xf8] sm:$0xff] }
 0x24c   :  { %2530 = vmatprep.subr.mxu1 %v4279_v22  ;;  %1103 = vmatprep.subr.mxu0 %v3615_v35 }
 0x24d   :  { %2531 = vmatpush3.msra.mxu1 %v3275_v36  ;;  %v3621_v36 = vld [vmem:[%s4232_s2 + $0xf0] sm:$0xff] }
 0x24e   :  { %2532 = vmatprep.subr.mxu1 %v4279_v22  ;;  %1104 = vmatpush1.msra.mxu0 %v3621_v36 }
 0x24f   :  { %2533 = vmatpush3.msra.mxu1 %v3284_v37  ;;  %v3627_v37 = vld [vmem:[%s4232_s2 + $0xe0] sm:$0xff] }
 0x250   :  { %2534 = vmatprep.subr.mxu1 %v4279_v22  ;;  %1105 = vmatprep.subr.mxu0 %v3627_v37 }
 0x251   :  { %2535 = vmatpush3.msra.mxu1 %v3293_v38  ;;  %v3633_v38 = vld [vmem:[%s4232_s2 + $0xd8] sm:$0xff] }
 0x252   :  { %2536 = vmatprep.subr.mxu1 %v4279_v22  ;;  %1106 = vmatpush1.msra.mxu0 %v3633_v38 }
 0x253   :  { %2537 = vmatpush3.msra.mxu1 %v3302_v39  ;;  %v3638_v39 = vld [vmem:[%s4232_s2 + $0xc8] sm:$0xff] }
 0x254   :  { %2538 = vmatprep.subr.mxu1 %v4279_v22  ;;  %1107 = vmatprep.subr.mxu0 %v3638_v39 }
 0x255   :  { %2539 = vmatpush3.msra.mxu1 %v4280_v46  ;;  %1108 = vmatpush1.msra.mxu0 %v3643_v11  ;;  %v3733_v46 = vld [vmem:[%s4232_s2 + $0x8] sm:$0xff] }
 0x256   :  { %2540 = vmatprep.subr.mxu1 %v4279_v22  ;;  %1109 = vmatprep.subr.mxu0 %v3649_v43  ;;  %4289 = vst [vmem:[#allocation5_spill] sm:$0xff] %v3733_v46 }
 0x257   :  { %2541 = vmatpush3.msra.mxu1 %v4283_v51  ;;  %1110 = vmatpush1.msra.mxu0 %v3655_v16 }
 0x258   :  { %2545 = vmatprep.subr.mxu1 %v4279_v22  ;;  %1111 = vmatprep.subr.mxu0 %v3661_v26 }
 0x259   :  { %1112 = vmatpush1.msra.mxu0 %v3667_v40 }
 0x25a   :  { %1113 = vmatprep.subr.mxu0 %v3673_v54 }
 0x25b   :  { %1114 = vmatpush1.msra.mxu0 %v3679_v62 }
 0x25c   :  { %1115 = vmatprep.subr.mxu0 %v3685_v56 }
 0x25d   :  { %1116 = vmatpush1.msra.mxu0 %v3691_v50 }
 0x25e   :  { %1117 = vmatprep.subr.mxu0 %v3697_v48 }
 0x25f   :  { %1118 = vmatpush1.msra.mxu0 %v3703_v60 }
 0x260   :  { %1119 = vmatprep.subr.mxu0 %v3709_v9 }
 0x261   :  { %1120 = vmatpush1.msra.mxu0 %v3715_v2 }
 0x262   :  { %1121 = vmatprep.subr.mxu0 %v3721_v45 }
 0x263   :  { %1122 = vmatpush1.msra.mxu0 %v3727_v5 }
 0x264   :  { %1123 = vmatprep.subr.mxu0 %v3733_v46 }
 0x265   :  { %1124 = vmatpush1.msra.mxu0 %v3739_v47 }
 0x266   :  { %1311 = vmatprep.subr.mxu0 %v3555_v21 }
 0x2f8   :  { %v941_v49 = vpop.f32.mrf.mxu0  ;;  %v1012_v51 = vpop.f32.mrf.mxu1 }
 0x2f9   :  { %v1016_v53 = vadd.f32 %v941_v49, %v4291_v52  ;;  %v1030_v6 = vadd.f32 %v3427_v3, %v1012_v51  ;;  %v3824_v49 = vld [vmem:[%s4232_s2 + $0x118] sm:$0xff]  ;;  %v3831_v51 = vld [vmem:[%s4232_s2 + $0x100] sm:$0xff]  ;;  %v3838_v52 = vld [vmem:[%s4232_s2 + $0xe8] sm:$0xff] }
 0x2fa   :  { %v2509_v55 = vpop.f32.mrf.mxu1  ;;  %v943_v58 = vpop.f32.mrf.mxu0 }
 0x2fb   :  { %v2183_v57 = vmul.f32 -1.442695, %v1016_v53  ;;  %v1023_v61 = vadd.f32 %v943_v58, %v4292_v59  ;;  %v3843_v53 = vld [vmem:[%s4232_s2 + $0xd0] sm:$0xff]  ;;  %v3850_v55 = vld [vmem:[%s4232_s2 + $0xb8] sm:$0xff]  ;;  %v3864_v58 = vld [vmem:[%s4232_s2 + $0x88] sm:$0xff] }
 0x2fc   :  { %v3871_v59 = vld [vmem:[%s4232_s2 + $0x70] sm:$0xff] }
 0x2fd   :  { %2707 = vpow2.f32 %v2183_v57  ;;  %v2184_v63 = vmul.f32 -1.442695, %v1023_v61  ;;  %v3857_v57 = vld [vmem:[%s4232_s2 + $0xa0] sm:$0xff]  ;;  %v3878_v61 = vld [vmem:[%s4232_s2 + $0x58] sm:$0xff] }
 0x2ff   :  { %2709 = vpow2.f32 %v2184_v63  ;;  %v3885_v63 = vld [vmem:[%s4232_s2 + $0x40] sm:$0xff] }
 0x30a   :  { %v2708_v0 = vpop.eup %2707 }
 0x30b   :  { %v1020_v1 = vadd.f32 1.0, %v2708_v0  ;;  %v3892_v0 = vld [vmem:[%s4232_s2 + $0x28] sm:$0xff] }
 0x30c   :  { %v2710_v4 = vpop.eup %2709  ;;  %4293 = vst [vmem:[#allocation8_spill] sm:$0xff] %v3892_v0 }
 0x30d   :  { %2711 = vrcp.f32 %v1020_v1  ;;  %v1027_v12 = vadd.f32 1.0, %v2710_v4  ;;  %v3899_v1 = vld [vmem:[%s4232_s2 + $0x10] sm:$0xff] }
 0x30e   :  { %4294 = vst [vmem:[#allocation9_spill] sm:$0xff] %v3899_v1 }
 0x31a   :  { %v2712_v7 = vpop.eup %2711 }
 0x31b   :  { %v1031_v8 = vmul.f32 %v2712_v7, %v1030_v6  ;;  %v4295_v7 = vld [vmem:[#allocation12_spill] sm:$0xff] }
 0x31d   :  { %v1032_v10 = vadd.f32 %v1031_v8, %v3414_v41  ;;  %v3796_v41 = vld [vmem:[%s4232_s2 + $0x178] sm:$0xff] }
 0x31f   :  { %2713 = vtanh.f32 %v1032_v10 }
 0x320   :  { %2715 = vrcp.f32 %v1027_v12 }
 0x32c   :  { %v2714_v13 = vpop.eup %2713 }
 0x32d   :  { %v1034_v14 = vsub.f32 %v3509_v23, %v2714_v13  ;;  %v2716_v15 = vpop.eup %2715  ;;  %v3817_v23 = vld [vmem:[%s4232_s2 + $0x130] sm:$0xff] }
 0x32f   :  { %v1035_v17 = vmul.f32 %v2716_v15, %v1034_v14  ;;  %v4296_v14 = vld [vmem:[#allocation13_spill] sm:$0xff] }
 0x331   :  { %v3750_v18 = vadd.f32 %v2714_v13, %v1035_v17 }
 0x333   :  { %2185 = vst [vmem:[%s4235_s5 + $0x10] sm:$0xff] %v3750_v18  ;;  %1158 = vmatmul.mubr.f32.vlgmr.msra.gmra.mxu0 %v3750_v18  ;;  %2543 = vmatmul.mubr.f32.vlgmr.msra.gmra.mxu1 %v3750_v18 }
 0x334   :  { %1312 = vmatpush1.msra.mxu0 %v3561_v24  ;;  %1375 = vmatprep.mubr.f32.mxu0 %v4279_v22 }
 0x335   :  { %1313 = vmatprep.subr.mxu0 %v3567_v27  ;;  %2577 = vmatprep.mubr.msk.f32.mxu1 %vm2769_vm0, %v4279_v22 }
 0x336   :  { %1314 = vmatpush1.msra.mxu0 %v3573_v28  ;;  %2546 = vmatpush3.msra.mxu1 %v3796_v41 }
 0x337   :  { %1315 = vmatprep.subr.mxu0 %v3579_v29  ;;  %2547 = vmatprep.subr.mxu1 %v4279_v22 }
 0x338   :  { %1316 = vmatpush1.msra.mxu0 %v3585_v30  ;;  %2548 = vmatpush3.msra.mxu1 %v3803_v19 }
 0x339   :  { %1317 = vmatprep.subr.mxu0 %v3591_v31  ;;  %2549 = vmatprep.subr.mxu1 %v4279_v22 }
 0x33a   :  { %1318 = vmatpush1.msra.mxu0 %v3597_v32  ;;  %2550 = vmatpush3.msra.mxu1 %v3810_v20 }
 0x33b   :  { %1319 = vmatprep.subr.mxu0 %v3603_v33  ;;  %2551 = vmatprep.subr.mxu1 %v4279_v22 }
 0x33c   :  { %1320 = vmatpush1.msra.mxu0 %v3609_v34  ;;  %2552 = vmatpush3.msra.mxu1 %v3817_v23 }
 0x33d   :  { %1321 = vmatprep.subr.mxu0 %v3615_v35  ;;  %2553 = vmatprep.subr.mxu1 %v4279_v22 }
 0x33e   :  { %1322 = vmatpush1.msra.mxu0 %v3621_v36  ;;  %2554 = vmatpush3.msra.mxu1 %v3824_v49 }
 0x33f   :  { %1323 = vmatprep.subr.mxu0 %v3627_v37  ;;  %2555 = vmatprep.subr.mxu1 %v4279_v22 }
 0x340   :  { %1324 = vmatpush1.msra.mxu0 %v3633_v38  ;;  %2556 = vmatpush3.msra.mxu1 %v3831_v51 }
 0x341   :  { %1325 = vmatprep.subr.mxu0 %v3638_v39  ;;  %2557 = vmatprep.subr.mxu1 %v4279_v22 }
 0x342   :  { %1326 = vmatpush1.msra.mxu0 %v3643_v11  ;;  %2558 = vmatpush3.msra.mxu1 %v3838_v52 }
 0x343   :  { %1327 = vmatprep.subr.mxu0 %v3649_v43  ;;  %2559 = vmatprep.subr.mxu1 %v4279_v22 }
 0x344   :  { %1328 = vmatpush1.msra.mxu0 %v3655_v16  ;;  %2560 = vmatpush3.msra.mxu1 %v3843_v53 }
 0x345   :  { %1329 = vmatprep.subr.mxu0 %v3661_v26  ;;  %2561 = vmatprep.subr.mxu1 %v4279_v22 }
 0x346   :  { %1330 = vmatpush1.msra.mxu0 %v3667_v40  ;;  %2562 = vmatpush3.msra.mxu1 %v3850_v55 }
 0x347   :  { %1331 = vmatprep.subr.mxu0 %v3673_v54  ;;  %2563 = vmatprep.subr.mxu1 %v4279_v22 }
 0x348   :  { %1332 = vmatpush1.msra.mxu0 %v3679_v62  ;;  %2564 = vmatpush3.msra.mxu1 %v3857_v57 }
 0x349   :  { %1333 = vmatprep.subr.mxu0 %v3685_v56  ;;  %2565 = vmatprep.subr.mxu1 %v4279_v22 }
 0x34a   :  { %1334 = vmatpush1.msra.mxu0 %v3691_v50  ;;  %2566 = vmatpush3.msra.mxu1 %v3864_v58 }
 0x34b   :  { %1335 = vmatprep.subr.mxu0 %v3697_v48  ;;  %2567 = vmatprep.subr.mxu1 %v4279_v22 }
 0x34c   :  { %1336 = vmatpush1.msra.mxu0 %v3703_v60  ;;  %2568 = vmatpush3.msra.mxu1 %v3871_v59 }
 0x34d   :  { %1337 = vmatprep.subr.mxu0 %v3709_v9  ;;  %2569 = vmatprep.subr.mxu1 %v4279_v22 }
 0x34e   :  { %1338 = vmatpush1.msra.mxu0 %v3715_v2  ;;  %2570 = vmatpush3.msra.mxu1 %v3878_v61 }
 0x34f   :  { %1339 = vmatprep.subr.mxu0 %v3721_v45  ;;  %2571 = vmatprep.subr.mxu1 %v4279_v22 }
 0x350   :  { %1340 = vmatpush1.msra.mxu0 %v3727_v5  ;;  %2572 = vmatpush3.msra.mxu1 %v3885_v63 }
 0x351   :  { %1341 = vmatprep.subr.mxu0 %v3733_v46  ;;  %2573 = vmatprep.subr.mxu1 %v4279_v22 }
 0x352   :  { %1342 = vmatpush1.msra.mxu0 %v3739_v47  ;;  %2574 = vmatpush3.msra.mxu1 %v3892_v0 }
 0x353   :  { %1529 = vmatprep.subr.mxu0 %v3555_v21  ;;  %2575 = vmatprep.subr.mxu1 %v4279_v22 }
 0x354   :  { %2576 = vmatpush3.msra.mxu1 %v3899_v1 }
 0x355   :  { %2580 = vmatprep.subr.mxu1 %v4279_v22 }
 0x3f3   :  { %v1159_v4 = vpop.f32.mrf.mxu0  ;;  %v1230_v6 = vpop.f32.mrf.mxu1 }
 0x3f4   :  { %v1234_v8 = vadd.f32 %v1159_v4, %v4295_v7  ;;  %v1248_v1 = vadd.f32 %v3427_v3, %v1230_v6 }
 0x3f5   :  { %v2544_v10 = vpop.f32.mrf.mxu1  ;;  %v1161_v13 = vpop.f32.mrf.mxu0 }
 0x3f6   :  { %v2186_v12 = vmul.f32 -1.442695, %v1234_v8  ;;  %v1241_v15 = vadd.f32 %v1161_v13, %v4296_v14 }
 0x3f8   :  { %2717 = vpow2.f32 %v2186_v12  ;;  %v2187_v17 = vmul.f32 -1.442695, %v1241_v15  ;;  %v4304_v15 = vld [vmem:[#allocation15_spill] sm:$0xff] }
 0x3fa   :  { %2719 = vpow2.f32 %v2187_v17 }
 0x405   :  { %v2718_v25 = vpop.eup %2717 }
 0x406   :  { %v1238_v44 = vadd.f32 1.0, %v2718_v25  ;;  %v4297_v25 = vld [vmem:[#allocation4_spill] sm:$0xff] }
 0x407   :  { %v2720_v21 = vpop.eup %2719 }
 0x408   :  { %2721 = vrcp.f32 %v1238_v44  ;;  %v1245_v5 = vadd.f32 1.0, %v2720_v21  ;;  %v4298_v44 = vld [vmem:[#allocation8_spill] sm:$0xff]  ;;  %v4300_v21 = vld [vmem:[#allocation7_spill] sm:$0xff] }
 0x415   :  { %v2722_v47 = vpop.eup %2721 }
 0x416   :  { %v1249_v46 = vmul.f32 %v2722_v47, %v1248_v1 }
 0x418   :  { %v1250_v0 = vadd.f32 %v1249_v46, %v3412_v42  ;;  %v4299_v42 = vld [vmem:[#allocation5_spill] sm:$0xff]  ;;  %v4302_v46 = vld [vmem:[#allocation6_spill] sm:$0xff] }
 0x41a   :  { %2723 = vtanh.f32 %v1250_v0  ;;  %v4303_v0 = vld [vmem:[#allocation14_spill] sm:$0xff] }
 0x41b   :  { %2725 = vrcp.f32 %v1245_v5  ;;  %v4301_v5 = vld [vmem:[#allocation9_spill] sm:$0xff] }
 0x427   :  { %v2724_v4 = vpop.eup %2723 }
 0x428   :  { %v1252_v7 = vsub.f32 %v3750_v18, %v2724_v4  ;;  %v2726_v8 = vpop.eup %2725 }
 0x42a   :  { %v1253_v10 = vmul.f32 %v2726_v8, %v1252_v7 }
 0x42c   :  { %v3910_v12 = vadd.f32 %v2724_v4, %v1253_v10 }
 0x42e   :  { %2188 = vst [vmem:[%s4235_s5 + $0x18] sm:$0xff] %v3910_v12  ;;  %1376 = vmatmul.mubr.f32.vlgmr.msra.gmra.mxu0 %v3910_v12  ;;  %2578 = vmatmul.mubr.f32.vlgmr.msra.gmra.mxu1 %v3910_v12 }
 0x42f   :  { %1530 = vmatpush1.msra.mxu0 %v3561_v24  ;;  %2581 = vmatpush3.msra.mxu1 %v3796_v41 }
 0x430   :  { %1531 = vmatprep.subr.mxu0 %v3567_v27  ;;  %2582 = vmatprep.subr.mxu1 %v4279_v22 }
 0x431   :  { %1532 = vmatpush1.msra.mxu0 %v3573_v28  ;;  %2583 = vmatpush3.msra.mxu1 %v3803_v19 }
 0x432   :  { %1533 = vmatprep.subr.mxu0 %v3579_v29  ;;  %2584 = vmatprep.subr.mxu1 %v4279_v22 }
 0x433   :  { %1534 = vmatpush1.msra.mxu0 %v3585_v30  ;;  %2585 = vmatpush3.msra.mxu1 %v3810_v20 }
 0x434   :  { %1535 = vmatprep.subr.mxu0 %v3591_v31  ;;  %2586 = vmatprep.subr.mxu1 %v4279_v22 }
 0x435   :  { %1536 = vmatpush1.msra.mxu0 %v3597_v32  ;;  %2587 = vmatpush3.msra.mxu1 %v3817_v23 }
 0x436   :  { %1537 = vmatprep.subr.mxu0 %v3603_v33  ;;  %2588 = vmatprep.subr.mxu1 %v4279_v22 }
 0x437   :  { %1538 = vmatpush1.msra.mxu0 %v3609_v34  ;;  %2589 = vmatpush3.msra.mxu1 %v3824_v49 }
 0x438   :  { %1539 = vmatprep.subr.mxu0 %v3615_v35  ;;  %2590 = vmatprep.subr.mxu1 %v4279_v22 }
 0x439   :  { %1540 = vmatpush1.msra.mxu0 %v3621_v36  ;;  %2591 = vmatpush3.msra.mxu1 %v3831_v51 }
 0x43a   :  { %1541 = vmatprep.subr.mxu0 %v3627_v37  ;;  %2592 = vmatprep.subr.mxu1 %v4279_v22 }
 0x43b   :  { %1542 = vmatpush1.msra.mxu0 %v3633_v38  ;;  %2593 = vmatpush3.msra.mxu1 %v3838_v52 }
 0x43c   :  { %1543 = vmatprep.subr.mxu0 %v3638_v39  ;;  %2594 = vmatprep.subr.mxu1 %v4279_v22 }
 0x43d   :  { %1544 = vmatpush1.msra.mxu0 %v3643_v11  ;;  %2595 = vmatpush3.msra.mxu1 %v3843_v53 }
 0x43e   :  { %1545 = vmatprep.subr.mxu0 %v3649_v43  ;;  %2596 = vmatprep.subr.mxu1 %v4279_v22 }
 0x43f   :  { %1546 = vmatpush1.msra.mxu0 %v3655_v16  ;;  %2597 = vmatpush3.msra.mxu1 %v3850_v55 }
 0x440   :  { %1547 = vmatprep.subr.mxu0 %v3661_v26  ;;  %2598 = vmatprep.subr.mxu1 %v4279_v22 }
 0x441   :  { %1548 = vmatpush1.msra.mxu0 %v3667_v40  ;;  %2599 = vmatpush3.msra.mxu1 %v3857_v57 }
 0x442   :  { %1549 = vmatprep.subr.mxu0 %v3673_v54  ;;  %2600 = vmatprep.subr.mxu1 %v4279_v22 }
 0x443   :  { %1550 = vmatpush1.msra.mxu0 %v3679_v62  ;;  %2601 = vmatpush3.msra.mxu1 %v3864_v58 }
 0x444   :  { %1551 = vmatprep.subr.mxu0 %v3685_v56  ;;  %2602 = vmatprep.subr.mxu1 %v4279_v22 }
 0x445   :  { %1552 = vmatpush1.msra.mxu0 %v3691_v50  ;;  %2603 = vmatpush3.msra.mxu1 %v3871_v59 }
 0x446   :  { %1553 = vmatprep.subr.mxu0 %v3697_v48  ;;  %2604 = vmatprep.subr.mxu1 %v4279_v22 }
 0x447   :  { %1554 = vmatpush1.msra.mxu0 %v3703_v60  ;;  %2605 = vmatpush3.msra.mxu1 %v3878_v61 }
 0x448   :  { %1555 = vmatprep.subr.mxu0 %v3709_v9  ;;  %2606 = vmatprep.subr.mxu1 %v4279_v22 }
 0x449   :  { %1556 = vmatpush1.msra.mxu0 %v3715_v2  ;;  %2607 = vmatpush3.msra.mxu1 %v3885_v63 }
 0x44a   :  { %1557 = vmatprep.subr.mxu0 %v3721_v45  ;;  %2608 = vmatprep.subr.mxu1 %v4279_v22 }
 0x44b   :  { %1558 = vmatpush1.msra.mxu0 %v4297_v25  ;;  %2609 = vmatpush3.msra.mxu1 %v4298_v44 }
 0x44c   :  { %1559 = vmatprep.subr.mxu0 %v4299_v42  ;;  %2610 = vmatprep.subr.mxu1 %v4279_v22  ;;  %v4305_v42 = vld [vmem:[#allocation24_spill] sm:$0xff] }
 0x44d   :  { %1560 = vmatpush1.msra.mxu0 %v4300_v21  ;;  %1593 = vmatprep.mubr.f32.mxu0 %v4279_v22 }
 0x44e   :  { %2611 = vmatpush3.msra.mxu1 %v4301_v5  ;;  %2612 = vmatprep.mubr.msk.f32.mxu1 %vm2769_vm0, %v4279_v22 }
 0x44f   :  { %1747 = vmatprep.subr.mxu0 %v4302_v46  ;;  %2615 = vmatprep.subr.mxu1 %v4279_v22 }
 0x4ee   :  { %v1377_v47 = vpop.f32.mrf.mxu0  ;;  %v1448_v18 = vpop.f32.mrf.mxu1 }
 0x4ef   :  { %v1452_v1 = vadd.f32 %v1377_v47, %v4303_v0  ;;  %v1466_v46 = vadd.f32 %v3427_v3, %v1448_v18  ;;  %v4306_v3 = vld [vmem:[#allocation4_spill] sm:$0xff] }
 0x4f0   :  { %v2579_v6 = vpop.f32.mrf.mxu1  ;;  %v1379_v14 = vpop.f32.mrf.mxu0  ;;  %v1933_v18 = vld [vmem:[%s4232_s2 + $0x80] sm:$0xff] }
 0x4f1   :  { %v2189_v13 = vmul.f32 -1.442695, %v1452_v1  ;;  %v1459_v17 = vadd.f32 %v1379_v14, %v4304_v15  ;;  %v1932_v14 = vld [vmem:[%s4232_s2 + $0x78] sm:$0xff]  ;;  %v1930_v15 = vld [vmem:[%s4232_s2 + $0x68] sm:$0xff] }
 0x4f3   :  { %2727 = vpow2.f32 %v2189_v13  ;;  %v2190_v4 = vmul.f32 -1.442695, %v1459_v17  ;;  %v1929_v17 = vld [vmem:[%s4232_s2 + $0x60] sm:$0xff] }
 0x4f5   :  { %2729 = vpow2.f32 %v2190_v4  ;;  %v1927_v4 = vld [vmem:[%s4232_s2 + $0x50] sm:$0xff] }
 0x500   :  { %v2728_v7 = vpop.eup %2727 }
 0x501   :  { %v1456_v8 = vadd.f32 1.0, %v2728_v7  ;;  %v1926_v7 = vld [vmem:[%s4232_s2 + $0x48] sm:$0xff] }
 0x502   :  { %v2730_v10 = vpop.eup %2729 }
 0x503   :  { %2731 = vrcp.f32 %v1456_v8  ;;  %v1463_v25 = vadd.f32 1.0, %v2730_v10  ;;  %v1924_v8 = vld [vmem:[%s4232_s2 + $0x38] sm:$0xff]  ;;  %v1923_v10 = vld [vmem:[%s4232_s2 + $0x30] sm:$0xff] }
 0x510   :  { %v2732_v5 = vpop.eup %2731 }
 0x511   :  { %v1467_v21 = vmul.f32 %v2732_v5, %v1466_v46  ;;  %v1935_v5 = vld [vmem:[%s4232_s2 + $0x90] sm:$0xff]  ;;  %v1921_v46 = vld [vmem:[%s4232_s2 + $0x20] sm:$0xff] }
 0x513   :  { %v1468_v44 = vadd.f32 %v1467_v21, %v4305_v42  ;;  %v1938_v42 = vld [vmem:[%s4232_s2 + $0xa8] sm:$0xff]  ;;  %v1936_v21 = vld [vmem:[%s4232_s2 + $0x98] sm:$0xff] }
 0x515   :  { %2733 = vtanh.f32 %v1468_v44  ;;  %v1939_v44 = vld [vmem:[%s4232_s2 + $0xb0] sm:$0xff] }
 0x516   :  { %2735 = vrcp.f32 %v1463_v25  ;;  %v1941_v25 = vld [vmem:[%s4232_s2 + $0xc0] sm:$0xff] }
 0x522   :  { %v2734_v47 = vpop.eup %2733 }
 0x523   :  { %v1470_v0 = vsub.f32 %v3910_v12, %v2734_v47  ;;  %v2736_v1 = vpop.eup %2735 }
 0x525   :  { %v1471_v6 = vmul.f32 %v2736_v1, %v1470_v0  ;;  %v1918_v0 = vld [vmem:[%s4232_s2 + $0x8] sm:$0xff]  ;;  %v1917_v1 = vld [vmem:[%s4232_s2] sm:$0xff] }
 0x527   :  { %v3990_v13 = vadd.f32 %v2734_v47, %v1471_v6  ;;  %v1920_v47 = vld [vmem:[%s4232_s2 + $0x18] sm:$0xff] }
 0x529   :  { %2191 = vst [vmem:[%s4235_s5 + $0x20] sm:$0xff] %v3990_v13  ;;  %1594 = vmatmul.mubr.f32.vlgmr.msra.gmra.mxu0 %v3990_v13  ;;  %2613 = vmatmul.mubr.f32.vlgmr.msra.gmra.mxu1 %v3990_v13 }
 0x52a   :  { %1748 = vmatpush1.msra.mxu0 %v3561_v24  ;;  %2616 = vmatpush3.msra.mxu1 %v3796_v41  ;;  %v4307_v24 = vld [vmem:[#allocation8_spill] sm:$0xff] }
 0x52b   :  { %1749 = vmatprep.subr.mxu0 %v3567_v27  ;;  %2617 = vmatprep.subr.mxu1 %v4279_v22  ;;  %v4308_v27 = vld [vmem:[#allocation5_spill] sm:$0xff] }
 0x52c   :  { %1750 = vmatpush1.msra.mxu0 %v3573_v28  ;;  %2618 = vmatpush3.msra.mxu1 %v3803_v19  ;;  %v4309_v28 = vld [vmem:[#allocation7_spill] sm:$0xff] }
 0x52d   :  { %1751 = vmatprep.subr.mxu0 %v3579_v29  ;;  %2619 = vmatprep.subr.mxu1 %v4279_v22  ;;  %v4310_v29 = vld [vmem:[#allocation9_spill] sm:$0xff] }
 0x52e   :  { %1752 = vmatpush1.msra.mxu0 %v3585_v30  ;;  %2620 = vmatpush3.msra.mxu1 %v3810_v20 }
 0x52f   :  { %1753 = vmatprep.subr.mxu0 %v3591_v31  ;;  %2621 = vmatprep.subr.mxu1 %v4279_v22 }
 0x530   :  { %1754 = vmatpush1.msra.mxu0 %v3597_v32  ;;  %2622 = vmatpush3.msra.mxu1 %v3817_v23  ;;  %v4311_v32 = vld [vmem:[#allocation16_spill] sm:$0xff] }
 0x531   :  { %1755 = vmatprep.subr.mxu0 %v3603_v33  ;;  %2623 = vmatprep.subr.mxu1 %v4279_v22 }
 0x532   :  { %1756 = vmatpush1.msra.mxu0 %v3609_v34  ;;  %2624 = vmatpush3.msra.mxu1 %v3824_v49 }
 0x533   :  { %1757 = vmatprep.subr.mxu0 %v3615_v35  ;;  %2625 = vmatprep.subr.mxu1 %v4279_v22 }
 0x534   :  { %1758 = vmatpush1.msra.mxu0 %v3621_v36  ;;  %2626 = vmatpush3.msra.mxu1 %v3831_v51 }
 0x535   :  { %1759 = vmatprep.subr.mxu0 %v3627_v37  ;;  %2627 = vmatprep.subr.mxu1 %v4279_v22  ;;  %v4312_v37 = vld [vmem:[#allocation17_spill] sm:$0xff] }
 0x536   :  { %1760 = vmatpush1.msra.mxu0 %v3633_v38  ;;  %2628 = vmatpush3.msra.mxu1 %v3838_v52 }
 0x537   :  { %1761 = vmatprep.subr.mxu0 %v3638_v39  ;;  %2629 = vmatprep.subr.mxu1 %v4279_v22 }
 0x538   :  { %1762 = vmatpush1.msra.mxu0 %v3643_v11  ;;  %2630 = vmatpush3.msra.mxu1 %v3843_v53 }
 0x539   :  { %1763 = vmatprep.subr.mxu0 %v3649_v43  ;;  %2631 = vmatprep.subr.mxu1 %v4279_v22 }
 0x53a   :  { %1764 = vmatpush1.msra.mxu0 %v3655_v16  ;;  %2632 = vmatpush3.msra.mxu1 %v3850_v55 }
 0x53b   :  { %1765 = vmatprep.subr.mxu0 %v3661_v26  ;;  %2633 = vmatprep.subr.mxu1 %v4279_v22  ;;  %v4069_v26 = vld [vmem:[%s4234_s4] ss:$0 sm:$0xff] }
 0x53c   :  { %1766 = vmatpush1.msra.mxu0 %v3667_v40  ;;  %2634 = vmatpush3.msra.mxu1 %v3857_v57 }
 0x53d   :  { %1767 = vmatprep.subr.mxu0 %v3673_v54  ;;  %2635 = vmatprep.subr.mxu1 %v4279_v22 }
 0x53e   :  { %1768 = vmatpush1.msra.mxu0 %v3679_v62  ;;  %2636 = vmatpush3.msra.mxu1 %v3864_v58 }
 0x53f   :  { %1769 = vmatprep.subr.mxu0 %v3685_v56  ;;  %2637 = vmatprep.subr.mxu1 %v4279_v22  ;;  %v4313_v56 = vld [vmem:[#allocation23_spill] sm:$0xff] }
 0x540   :  { %1770 = vmatpush1.msra.mxu0 %v3691_v50  ;;  %2638 = vmatpush3.msra.mxu1 %v3871_v59 }
 0x541   :  { %1771 = vmatprep.subr.mxu0 %v3697_v48  ;;  %2639 = vmatprep.subr.mxu1 %v4279_v22 }
 0x542   :  { %1772 = vmatpush1.msra.mxu0 %v3703_v60  ;;  %2640 = vmatpush3.msra.mxu1 %v3878_v61 }
 0x543   :  { %1773 = vmatprep.subr.mxu0 %v3709_v9  ;;  %2641 = vmatprep.subr.mxu1 %v4279_v22 }
 0x544   :  { %1774 = vmatpush1.msra.mxu0 %v3715_v2  ;;  %2642 = vmatpush3.msra.mxu1 %v3885_v63 }
 0x545   :  { %1775 = vmatprep.subr.mxu0 %v3721_v45  ;;  %2643 = vmatprep.subr.mxu1 %v4279_v22 }
 0x546   :  { %1776 = vmatpush1.msra.mxu0 %v4306_v3  ;;  %2644 = vmatpush3.msra.mxu1 %v4307_v24  ;;  %v4314_v3 = vld [vmem:[#allocation18_spill] sm:$0xff] }
 0x547   :  { %1777 = vmatprep.subr.mxu0 %v4308_v27  ;;  %2645 = vmatprep.subr.mxu1 %v4279_v22 }
 0x548   :  { %1778 = vmatpush1.msra.mxu0 %v4309_v28  ;;  %1811 = vmatprep.mubr.f32.mxu0 %v4279_v22 }
 0x549   :  { %2646 = vmatpush3.msra.mxu1 %v4310_v29  ;;  %2647 = vmatprep.mubr.msk.f32.mxu1 %vm2769_vm0, %v4279_v22 }
 0x54a   :  { %2650 = vmatprep.subr.mxu1 %v4279_v22 }
 0x5e9   :  { %v1595_v30 = vpop.f32.mrf.mxu0  ;;  %v1666_v31 = vpop.f32.mrf.mxu1 }
 0x5ea   :  { %v1670_v33 = vadd.f32 %v1595_v30, %v4311_v32  ;;  %v1684_v40 = vadd.f32 %v4069_v26, %v1666_v31  ;;  %v4315_v30 = vld [vmem:[#allocation19_spill] sm:$0xff] }
 0x5eb   :  { %v2614_v34 = vpop.f32.mrf.mxu1  ;;  %v1597_v36 = vpop.f32.mrf.mxu0 }
 0x5ec   :  { %v2192_v35 = vmul.f32 -1.442695, %v1670_v33  ;;  %v1677_v38 = vadd.f32 %v1597_v36, %v4312_v37 }
 0x5ee   :  { %2737 = vpow2.f32 %v2192_v35  ;;  %v2193_v39 = vmul.f32 -1.442695, %v1677_v38 }
 0x5f0   :  { %2739 = vpow2.f32 %v2193_v39  ;;  %v4316_v39 = vld [vmem:[#allocation26_spill] sm:$0xff] }
 0x5fb   :  { %v2738_v11 = vpop.eup %2737 }
 0x5fc   :  { %v1674_v43 = vadd.f32 1.0, %v2738_v11 }
 0x5fd   :  { %v2740_v16 = vpop.eup %2739 }
 0x5fe   :  { %2741 = vrcp.f32 %v1674_v43  ;;  %v1681_v48 = vadd.f32 1.0, %v2740_v16 }
 0x60b   :  { %v2742_v54 = vpop.eup %2741 }
 0x60c   :  { %v1685_v62 = vmul.f32 %v2742_v54, %v1684_v40 }
 0x60e   :  { %v1686_v50 = vadd.f32 %v1685_v62, %v4313_v56 }
 0x610   :  { %2743 = vtanh.f32 %v1686_v50 }
 0x611   :  { %2745 = vrcp.f32 %v1681_v48 }
 0x61d   :  { %v2744_v60 = vpop.eup %2743 }
 0x61e   :  { %v1688_v9 = vsub.f32 %v3990_v13, %v2744_v60  ;;  %v2746_v2 = vpop.eup %2745 }
 0x620   :  { %v1689_v45 = vmul.f32 %v2746_v2, %v1688_v9 }
 0x622   :  { %v4074_v12 = vadd.f32 %v2744_v60, %v1689_v45  ;;  %v4317_v60 = vld [vmem:[#allocation21_spill] sm:$0xff] }
 0x624   :  { %2194 = vst [vmem:[%s4235_s5 + $0x28] sm:$0xff] %v4074_v12  ;;  %1812 = vmatmul.mubr.f32.vlgmr.msra.gmra.mxu0 %v4074_v12  ;;  %2648 = vmatmul.mubr.f32.vlgmr.msra.gmra.mxu1 %v4074_v12 }
 0x625   :  { %2651 = vmatpush3.msra.mxu1 %v3796_v41  ;;  %2029 = vmatprep.mubr.f32.mxu0 %v4279_v22  ;;  %v1963_v41 = vld [vmem:[%s4232_s2 + $0x170] sm:$0xff] }
 0x626   :  { %2652 = vmatprep.subr.mxu1 %v4279_v22  ;;  %2682 = vmatprep.mubr.msk.f32.mxu1 %vm2769_vm0, %v4279_v22 }
 0x627   :  { %2653 = vmatpush3.msra.mxu1 %v3803_v19  ;;  %1965 = vmatprep.subr.mxu0 %v1963_v41  ;;  %v1962_v19 = vld [vmem:[%s4232_s2 + $0x168] sm:$0xff] }
 0x628   :  { %2654 = vmatprep.subr.mxu1 %v4279_v22  ;;  %1966 = vmatpush1.msra.mxu0 %v1962_v19  ;;  %v4318_v19 = vld [vmem:[#allocation22_spill] sm:$0xff] }
 0x629   :  { %2655 = vmatpush3.msra.mxu1 %v3810_v20  ;;  %v1960_v20 = vld [vmem:[%s4232_s2 + $0x158] sm:$0xff] }
 0x62a   :  { %2656 = vmatprep.subr.mxu1 %v4279_v22  ;;  %1967 = vmatprep.subr.mxu0 %v1960_v20 }
 0x62b   :  { %2657 = vmatpush3.msra.mxu1 %v3817_v23  ;;  %v1957_v23 = vld [vmem:[%s4232_s2 + $0x140] sm:$0xff] }
 0x62c   :  { %2658 = vmatprep.subr.mxu1 %v4279_v22 }
 0x62d   :  { %2659 = vmatpush3.msra.mxu1 %v3824_v49  ;;  %v1956_v49 = vld [vmem:[%s4232_s2 + $0x138] sm:$0xff] }
 0x62e   :  { %2660 = vmatprep.subr.mxu1 %v4279_v22 }
 0x62f   :  { %2661 = vmatpush3.msra.mxu1 %v3831_v51  ;;  %v1954_v51 = vld [vmem:[%s4232_s2 + $0x128] sm:$0xff] }
 0x630   :  { %2662 = vmatprep.subr.mxu1 %v4279_v22 }
 0x631   :  { %2663 = vmatpush3.msra.mxu1 %v3838_v52  ;;  %v1953_v52 = vld [vmem:[%s4232_s2 + $0x120] sm:$0xff] }
 0x632   :  { %2664 = vmatprep.subr.mxu1 %v4279_v22 }
 0x633   :  { %2665 = vmatpush3.msra.mxu1 %v3843_v53  ;;  %v1951_v53 = vld [vmem:[%s4232_s2 + $0x110] sm:$0xff] }
 0x634   :  { %2666 = vmatprep.subr.mxu1 %v4279_v22 }
 0x635   :  { %2667 = vmatpush3.msra.mxu1 %v3850_v55  ;;  %v1950_v55 = vld [vmem:[%s4232_s2 + $0x108] sm:$0xff] }
 0x636   :  { %2668 = vmatprep.subr.mxu1 %v4279_v22 }
 0x637   :  { %2669 = vmatpush3.msra.mxu1 %v3857_v57  ;;  %v1948_v57 = vld [vmem:[%s4232_s2 + $0xf8] sm:$0xff] }
 0x638   :  { %2670 = vmatprep.subr.mxu1 %v4279_v22 }
 0x639   :  { %2671 = vmatpush3.msra.mxu1 %v3864_v58  ;;  %v1947_v58 = vld [vmem:[%s4232_s2 + $0xf0] sm:$0xff] }
 0x63a   :  { %2672 = vmatprep.subr.mxu1 %v4279_v22 }
 0x63b   :  { %2673 = vmatpush3.msra.mxu1 %v3871_v59  ;;  %v1945_v59 = vld [vmem:[%s4232_s2 + $0xe0] sm:$0xff] }
 0x63c   :  { %2674 = vmatprep.subr.mxu1 %v4279_v22 }
 0x63d   :  { %2675 = vmatpush3.msra.mxu1 %v3878_v61  ;;  %v1944_v61 = vld [vmem:[%s4232_s2 + $0xd8] sm:$0xff] }
 0x63e   :  { %2676 = vmatprep.subr.mxu1 %v4279_v22 }
 0x63f   :  { %2677 = vmatpush3.msra.mxu1 %v3885_v63  ;;  %v1942_v63 = vld [vmem:[%s4232_s2 + $0xc8] sm:$0xff] }
 0x640   :  { %2678 = vmatprep.subr.mxu1 %v4279_v22 }
 0x641   :  { %2679 = vmatpush3.msra.mxu1 %v4307_v24 }
 0x642   :  { %2680 = vmatprep.subr.mxu1 %v4279_v22  ;;  %v1959_v22 = vld [vmem:[%s4232_s2 + $0x150] sm:$0xff] }
 0x643   :  { %2681 = vmatpush3.msra.mxu1 %v4310_v29  ;;  %1968 = vmatpush1.msra.mxu0 %v1959_v22 }
 0x644   :  { %1969 = vmatprep.subr.mxu0 %v1957_v23 }
 0x645   :  { %1970 = vmatpush1.msra.mxu0 %v1956_v49 }
 0x646   :  { %1971 = vmatprep.subr.mxu0 %v1954_v51 }
 0x647   :  { %1972 = vmatpush1.msra.mxu0 %v1953_v52 }
 0x648   :  { %1973 = vmatprep.subr.mxu0 %v1951_v53 }
 0x649   :  { %1974 = vmatpush1.msra.mxu0 %v1950_v55  ;;  %v4319_v55 = vld [vmem:[#allocation25_spill] sm:$0xff] }
 0x64a   :  { %1975 = vmatprep.subr.mxu0 %v1948_v57 }
 0x64b   :  { %1976 = vmatpush1.msra.mxu0 %v1947_v58 }
 0x64c   :  { %1977 = vmatprep.subr.mxu0 %v1945_v59 }
 0x64d   :  { %1978 = vmatpush1.msra.mxu0 %v1944_v61 }
 0x64e   :  { %1979 = vmatprep.subr.mxu0 %v1942_v63 }
 0x64f   :  { %1980 = vmatpush1.msra.mxu0 %v1941_v25 }
 0x650   :  { %1981 = vmatprep.subr.mxu0 %v1939_v44 }
 0x651   :  { %1982 = vmatpush1.msra.mxu0 %v1938_v42 }
 0x652   :  { %1983 = vmatprep.subr.mxu0 %v1936_v21 }
 0x653   :  { %1984 = vmatpush1.msra.mxu0 %v1935_v5 }
 0x654   :  { %1985 = vmatprep.subr.mxu0 %v1933_v18 }
 0x655   :  { %1986 = vmatpush1.msra.mxu0 %v1932_v14 }
 0x656   :  { %1987 = vmatprep.subr.mxu0 %v1930_v15 }
 0x657   :  { %1988 = vmatpush1.msra.mxu0 %v1929_v17 }
 0x658   :  { %1989 = vmatprep.subr.mxu0 %v1927_v4 }
 0x659   :  { %1990 = vmatpush1.msra.mxu0 %v1926_v7 }
 0x65a   :  { %1991 = vmatprep.subr.mxu0 %v1924_v8 }
 0x65b   :  { %1992 = vmatpush1.msra.mxu0 %v1923_v10 }
 0x65c   :  { %1993 = vmatprep.subr.mxu0 %v1921_v46 }
 0x65d   :  { %1994 = vmatpush1.msra.mxu0 %v1920_v47 }
 0x65e   :  { %1995 = vmatprep.subr.mxu0 %v1918_v0 }
 0x65f   :  { %1996 = vmatpush1.msra.mxu0 %v1917_v1 }
 0x6e4   :  { %v1813_v6 = vpop.f32.mrf.mxu0  ;;  %v1884_v13 = vpop.f32.mrf.mxu1 }
 0x6e5   :  { %v1888_v24 = vadd.f32 %v1813_v6, %v4314_v3  ;;  %v1902_v36 = vadd.f32 %v4069_v26, %v1884_v13 }
 0x6e6   :  { %v2649_v27 = vpop.f32.mrf.mxu1  ;;  %v1815_v29 = vpop.f32.mrf.mxu0 }
 0x6e7   :  { %v2195_v28 = vmul.f32 -1.442695, %v1888_v24  ;;  %v1895_v31 = vadd.f32 %v1815_v29, %v4315_v30 }
 0x6e9   :  { %2747 = vpow2.f32 %v2195_v28  ;;  %v2196_v32 = vmul.f32 -1.442695, %v1895_v31 }
 0x6eb   :  { %2749 = vpow2.f32 %v2196_v32 }
 0x6f6   :  { %v2748_v33 = vpop.eup %2747 }
 0x6f7   :  { %v1892_v34 = vadd.f32 1.0, %v2748_v33 }
 0x6f8   :  { %v2750_v35 = vpop.eup %2749 }
 0x6f9   :  { %2751 = vrcp.f32 %v1892_v34  ;;  %v1899_v43 = vadd.f32 1.0, %v2750_v35 }
 0x706   :  { %v2752_v37 = vpop.eup %2751 }
 0x707   :  { %v1903_v38 = vmul.f32 %v2752_v37, %v1902_v36 }
 0x709   :  { %v1904_v11 = vadd.f32 %v1903_v38, %v4316_v39 }
 0x70b   :  { %2753 = vtanh.f32 %v1904_v11 }
 0x70c   :  { %2755 = vrcp.f32 %v1899_v43 }
 0x718   :  { %v2754_v16 = vpop.eup %2753 }
 0x719   :  { %v1906_v40 = vsub.f32 %v4074_v12, %v2754_v16  ;;  %v2756_v54 = vpop.eup %2755 }
 0x71b   :  { %v1907_v62 = vmul.f32 %v2756_v54, %v1906_v40 }
 0x71d   :  { %v1908_v56 = vadd.f32 %v2754_v16, %v1907_v62 }
 0x71f   :  { %2197 = vst [vmem:[%s4235_s5 + $0x30] sm:$0xff] %v1908_v56  ;;  %2030 = vmatmul.mubr.f32.vlgmr.msra.gmra.mxu0 %v1908_v56  ;;  %2683 = vmatmul.mubr.f32.vlgmr.msra.gmra.mxu1 %v1908_v56 }
 0x7df   :  { %v2031_v50 = vpop.f32.mrf.mxu0  ;;  %v2102_v48 = vpop.f32.mrf.mxu1 }
 0x7e0   :  { %v2106_v9 = vadd.f32 %v2031_v50, %v4317_v60  ;;  %v2120_v51 = vadd.f32 %v4069_v26, %v2102_v48 }
 0x7e1   :  { %v2684_v2 = vpop.f32.mrf.mxu1  ;;  %v2033_v41 = vpop.f32.mrf.mxu0 }
 0x7e2   :  { %v2198_v45 = vmul.f32 -1.442695, %v2106_v9  ;;  %v2113_v20 = vadd.f32 %v2033_v41, %v4318_v19 }
 0x7e4   :  { %2757 = vpow2.f32 %v2198_v45  ;;  %v2199_v12 = vmul.f32 -1.442695, %v2113_v20 }
 0x7e6   :  { %2759 = vpow2.f32 %v2199_v12 }
 0x7f1   :  { %v2758_v22 = vpop.eup %2757 }
 0x7f2   :  { %v2110_v23 = vadd.f32 1.0, %v2758_v22 }
 0x7f3   :  { %v2760_v49 = vpop.eup %2759 }
 0x7f4   :  { %2761 = vrcp.f32 %v2110_v23  ;;  %v2117_v58 = vadd.f32 1.0, %v2760_v49 }
 0x801   :  { %v2762_v52 = vpop.eup %2761 }
 0x802   :  { %v2121_v53 = vmul.f32 %v2762_v52, %v2120_v51 }
 0x804   :  { %v2122_v57 = vadd.f32 %v2121_v53, %v4319_v55 }
 0x806   :  { %2763 = vtanh.f32 %v2122_v57 }
 0x807   :  { %2765 = vrcp.f32 %v2117_v58 }
 0x813   :  { %v2764_v59 = vpop.eup %2763 }
 0x814   :  { %v2124_v61 = vsub.f32 %v1908_v56, %v2764_v59  ;;  %v2766_v63 = vpop.eup %2765 }
 0x816   :  { %v2125_v25 = vmul.f32 %v2766_v63, %v2124_v61 }
 0x818   :  { %v2126_v44 = vadd.f32 %v2764_v59, %v2125_v25 }
 0x81a   :  { %2200 = vst [vmem:[%s4235_s5 + $0x38] sm:$0xff] %v2126_v44  ;;  %2133 = vst [vmem:[%s4236_s6] sm:$0xff] %v2126_v44 }

</bundles_post_ra>
